<compile_context>
chip_gen: v5e
topology: v5e:2x2
jax: 0.10.0
libtpu: 0.0.40
codegen_flags: <defaults>
</compile_context>

<pallas_src>
import jax
import jax.numpy as jnp
import numpy as np
from jax import lax
from jax.experimental import pallas as pl
from jax.experimental.pallas import tpu as pltpu


def _dot(a, b):
    """Single-pass MXU matmul: bf16 x bf16 operands, f32 accumulation."""
    return jnp.dot(a.astype(jnp.bfloat16), b.astype(jnp.bfloat16),
                   preferred_element_type=jnp.float32)


def _dot_t(a, b):
    """a @ b.T (contract last dims of both) without materializing a transpose."""
    return lax.dot_general(a.astype(jnp.bfloat16), b.astype(jnp.bfloat16),
                           (((1,), (1,)), ((), ())),
                           preferred_element_type=jnp.float32)


# ----------------------------------------------------------------------------
# Fused kernel: temporal attention -> Chebyshev graph conv (pos/neg) ->
# time conv + residual + relu -> LayerNorm.  One grid step per batch block.
# ----------------------------------------------------------------------------
def _fused_adapgl_kernel(
    x_ref,      # (bb*c, nfp)          bf16  lane-padded node-major input block
    k12_ref,    # (nfp, n)             bf16  kron(w1, I_f) @ w2.T
    k3_ref,     # (nfp, n)             bf16  kron(I_n, w3)
    be_ref,     # (bb*c, bb*c)         f32   tile(be)
    ve_ref,     # (bb*c, bb*c)         bf16  kron(I_bb, ve)
    msk_ref,    # (bb*c, bb*c)         f32   0 on diag blocks, -1e9 off-diag
    kap_ref,    # (nfp, nfp)           bf16  kron(adj.T, I_f), zero padded
    kan_ref,    # (nfp, nfp)           bf16  kron(adj,   I_f), zero padded
    wc0_ref,    # (nfp, 2*n*ncf2)      bf16  [kron(I_n,wp0) | kron(I_n,wn0)]
    wc1_ref,    # (2*nfp, 2*n*ncf2)    bf16  blockdiag(kron(I_n,wp1), kron(I_n,wn1))
    wc2_ref,    # (2*nfp, 2*n*ncf2)    bf16  blockdiag(kron(I_n,wp2), kron(I_n,wn2))
    wt_ref,     # (ks*2*n*ncf2, n*ntf) bf16  time-conv taps stacked along rows
    wr_ref,     # (nfp, n*ntf)         bf16  kron(I_n, wr)   (1x1 residual conv)
    bias_ref,   # (1, n*ntf)           f32   tile(bt + br)
    shift_ref,  # (ks, bb*c, bb*c)     bf16  kron(I_bb, banded time shift_k)
    gmean_ref,  # (n*ntf, n*ntf)       bf16  kron(I_n, 1/ntf)  (group-mean matrix)
    gamma_ref,  # (1, n*ntf)           f32
    beta_ref,   # (1, n*ntf)           f32
    out_ref,    # (bb*c, n*ntf)        f32   lane-dense output block
):
    x = x_ref[...]
    bbc = x.shape[0]
    ks = shift_ref.shape[0]

    # ---------------- temporal attention (block-diagonal over the batch) ----
    y1 = _dot(x, k12_ref[...])                       # (bbc, n)
    xw3 = _dot(x, k3_ref[...])                       # (bbc, n)
    prod = _dot_t(y1, xw3)                           # (bbc, bbc)
    sig = 0.5 * (jnp.tanh(0.5 * (prod + be_ref[...])) + 1.0)   # sigmoid (EUP)
    logits = _dot(ve_ref[...], sig) + msk_ref[...]   # mask kills cross-batch terms
    e = jnp.exp(logits - jnp.max(logits, axis=-1, keepdims=True))
    e = e * pl.reciprocal(jnp.sum(e, axis=-1, keepdims=True), approx=True)
    x_tat = _dot(e, x)                               # (bbc, nfp), stays in vregs

    # ---------------- Chebyshev graph conv, pos + neg adjacency (K = 3) -----
    kap = kap_ref[...]
    kan = kan_ref[...]
    t1p = _dot(x_tat, kap)
    t1n = _dot(x_tat, kan)
    t2p = 2.0 * _dot(t1p, kap) - x_tat
    t2n = 2.0 * _dot(t1n, kan) - x_tat
    t1 = jnp.concatenate([t1p, t1n], axis=-1)        # (bbc, 2*nfp)
    t2 = jnp.concatenate([t2p, t2n], axis=-1)
    # produces hcat = [hp | hn] directly (pos/neg branches fused per order)
    hcat = (_dot(x_tat, wc0_ref[...]) + _dot(t1, wc1_ref[...])
            + _dot(t2, wc2_ref[...]))
    hcat = jnp.maximum(hcat, 0.0)                    # (bbc, 2*n*ncf2)

    # ---------------- (1 x ks) time conv + 1x1 residual conv ----------------
    # Row shifts as tiny MXU matmuls (no masked stores), all taps in ONE GEMM.
    h_sh = jnp.concatenate([_dot(shift_ref[k], hcat) for k in range(ks)], axis=-1)
    conv = _dot(h_sh, wt_ref[...])                   # (bbc, n*ntf)
    res = _dot(x, wr_ref[...])
    y = jnp.maximum(conv + res + bias_ref[...], 0.0)

    # ---------------- LayerNorm over each ntf lane group --------------------
    # mu and E[y^2] in a single gmean GEMM by sublane-stacking [y ; y*y].
    stats = _dot(jnp.concatenate([y, y * y], axis=0), gmean_ref[...])
    mu = stats[:bbc]
    var = jnp.maximum(stats[bbc:] - mu * mu, 0.0)
    out_ref[...] = (y - mu) * lax.rsqrt(var + 1e-5) * gamma_ref[...] + beta_ref[...]


# ----------------------------------------------------------------------------
# Wrapper: all kron / tile / fuse / pad preprocessing happens here (XLA side),
# so the kernel contains no relayout work; single fused pallas_call over batch.
# ----------------------------------------------------------------------------
def adap_gl_block_a(x, adj, p, *, batch_block=None):
    b, c, n, f = x.shape
    ncf2 = p["wp"].shape[1]
    ks, ncf, ntf = p["wt"].shape
    assert ncf == 2 * ncf2

    # Batch elements folded into GEMM M per grid step (v5e/v6e: bigger is
    # better since the grid is a serial loop on one TC; v7x: use b // 2).
    bb = batch_block if batch_block is not None else (2 if b % 2 == 0 else 1)
    assert b % bb == 0
    bbc = bb * c

    nf, nc2, nt = n * f, n * ncf2, n * ntf
    nfp = ((nf + 127) // 128) * 128      # pad early-GEMM contraction to 128 lanes
    pad_r = nfp - nf

    f32, bf16 = jnp.float32, jnp.bfloat16
    eye_f = jnp.eye(f, dtype=f32)
    eye_n = jnp.eye(n, dtype=f32)
    eye_b = jnp.eye(bb, dtype=f32)

    def pad_rows(m):
        return jnp.pad(m, ((0, pad_r), (0, 0))) if pad_r else m

    # Temporal attention weights (w1 and w2 fused into one operand).
    k12 = pad_rows(jnp.kron(p["w1"].reshape(n, 1), eye_f) @ p["w2"].T)    # (nfp, n)
    k3 = pad_rows(jnp.kron(eye_n, p["w3"].reshape(f, 1)))                 # (nfp, n)
    be_t = jnp.tile(p["be"], (bb, bb)).astype(f32)                        # (bbc, bbc)
    ve_bd = jnp.kron(eye_b, p["ve"])                                      # (bbc, bbc)
    amask = (jnp.kron(eye_b, jnp.ones((c, c), f32)) - 1.0) * 1e9          # (bbc, bbc)

    # Chebyshev graph conv weights (pos | neg fused per Chebyshev order).
    kap = jnp.pad(jnp.kron(adj.T, eye_f), ((0, pad_r), (0, pad_r)))
    kan = jnp.pad(jnp.kron(adj, eye_f), ((0, pad_r), (0, pad_r)))

    def cheb_w(i):
        wp_i = pad_rows(jnp.kron(eye_n, p["wp"][i * f:(i + 1) * f]))      # (nfp, nc2)
        wn_i = pad_rows(jnp.kron(eye_n, p["wn"][i * f:(i + 1) * f]))
        return wp_i, wn_i

    wp0, wn0 = cheb_w(0)
    wc0 = jnp.concatenate([wp0, wn0], axis=1)                             # (nfp, 2*nc2)
    zblk = jnp.zeros((nfp, nc2), f32)

    def blockdiag(a_, b_):
        return jnp.concatenate([jnp.concatenate([a_, zblk], axis=1),
                                jnp.concatenate([zblk, b_], axis=1)], axis=0)

    wc1 = blockdiag(*cheb_w(1))                                           # (2*nfp, 2*nc2)
    wc2 = blockdiag(*cheb_w(2))

    # Time conv: tap weights stacked along rows; residual conv; fused biases.
    wt_all = jnp.concatenate(
        [jnp.concatenate([jnp.kron(eye_n, p["wt"][k, :ncf2]),
                          jnp.kron(eye_n, p["wt"][k, ncf2:])], axis=0)
         for k in range(ks)], axis=0)                                     # (ks*2*nc2, nt)
    wr = pad_rows(jnp.kron(eye_n, p["wr"]))                               # (nfp, nt)
    bias = jnp.tile(p["bt"] + p["br"], (1, n)).astype(f32)                # (1, nt)

    # Banded time-shift matrices, block-diagonal over the batch block.
    pad_t = (ks - 1) // 2
    sh_np = np.zeros((ks, bbc, bbc), np.float32)
    for k in range(ks):
        s = k - pad_t
        for i in range(bb):
            for t in range(c):
                r = t + s
                if 0 <= r < c:
                    sh_np[k, i * c + t, i * c + r] = 1.0
    shift = jnp.asarray(sh_np)

    # LayerNorm over per-node lane groups of width ntf.
    gmean = jnp.kron(eye_n, jnp.full((ntf, ntf), 1.0 / ntf, f32))         # (nt, nt)
    gamma = jnp.tile(p["gamma"], (1, n)).astype(f32)
    beta = jnp.tile(p["beta"], (1, n)).astype(f32)

    # bf16 operands: halves weight DMA bytes, 1-pass MXU matmuls in-kernel.
    x_flat = jnp.pad(x.reshape(b * c, nf), ((0, 0), (0, pad_r))).astype(bf16)
    k12, k3, ve_bd = k12.astype(bf16), k3.astype(bf16), ve_bd.astype(bf16)
    kap, kan = kap.astype(bf16), kan.astype(bf16)
    wc0, wc1, wc2 = wc0.astype(bf16), wc1.astype(bf16), wc2.astype(bf16)
    wt_all, wr = wt_all.astype(bf16), wr.astype(bf16)
    shift, gmean = shift.astype(bf16), gmean.astype(bf16)

    def rep(shape):   # grid-invariant operand: fetched once, reused every step
        return pl.BlockSpec(shape, lambda i, _s=shape: (0,) * len(_s))

    # TODO(synk): on v7x, single-buffer these invariant weight specs
    # (pipeline_mode=pl.Buffered(1)) and prefetch next-layer kron weights with
    # a cross-pallas_call DMA future; left at Pallas defaults here.
    out_flat = pl.pallas_call(
        _fused_adapgl_kernel,
        out_shape=jax.ShapeDtypeStruct((b * c, nt), jnp.float32),
        grid=(b // bb,),
        in_specs=[
            pl.BlockSpec((bbc, nfp), lambda i: (i, 0)),
            rep((nfp, n)), rep((nfp, n)),
            rep((bbc, bbc)), rep((bbc, bbc)), rep((bbc, bbc)),
            rep((nfp, nfp)), rep((nfp, nfp)),
            rep((nfp, 2 * nc2)), rep((2 * nfp, 2 * nc2)), rep((2 * nfp, 2 * nc2)),
            rep((ks * 2 * nc2, nt)), rep((nfp, nt)), rep((1, nt)),
            rep((ks, bbc, bbc)),
            rep((nt, nt)), rep((1, nt)), rep((1, nt)),
        ],
        out_specs=pl.BlockSpec((bbc, nt), lambda i: (i, 0)),
        compiler_params=pltpu.CompilerParams(
            dimension_semantics=("parallel",)),
    )(x_flat, k12, k3, be_t, ve_bd, amask, kap, kan, wc0, wc1, wc2,
      wt_all, wr, bias, shift, gmean, gamma, beta)

    return out_flat.reshape(b, c, n, ntf)            # free metadata reshape


# ----------------------------------------------------------------------------
# Pure-JAX reference (mirrors the PyTorch forward) for correctness checking.
# ----------------------------------------------------------------------------
def reference_forward(x, adj, p):
    b, c, n, f = x.shape
    w1, w2, w3 = p["w1"][0], p["w2"], p["w3"][0]
    be, ve = p["be"], p["ve"]

    xw1 = jnp.einsum("bcnf,n->bcf", x, w1)
    y1 = jnp.einsum("bcf,nf->bcn", xw1, w2)
    xw3 = jnp.einsum("bcnf,f->bcn", x, w3)
    product = jnp.einsum("bcn,bdn->bcd", y1, xw3)
    e = jnp.einsum("ck,bkd->bcd", ve, jax.nn.sigmoid(product + be[None]))
    e = jax.nn.softmax(e, axis=-1)
    x_tat = jnp.einsum("bcd,bdk->bck", e, x.reshape(b, c, n * f)).reshape(b, c, n, f)

    xg = x_tat.reshape(b * c, n, f)

    def cheb(a, w):
        h0 = xg
        h1 = jnp.einsum("nm,bmf->bnf", a, h0)
        h2 = 2.0 * jnp.einsum("nm,bmf->bnf", a, h1) - h0
        hcat = jnp.concatenate([h0, h1, h2], axis=-1)
        return jnp.einsum("bnk,ko->bno", hcat, w)

    hp = cheb(adj, p["wp"])
    hn = cheb(adj.T, p["wn"])
    h = jax.nn.relu(jnp.concatenate([hp, hn], axis=-1)).reshape(b, c, n, -1)

    ks, _, ntf = p["wt"].shape
    pad = (ks - 1) // 2
    h_pad = jnp.pad(h, ((0, 0), (pad, pad), (0, 0), (0, 0)))
    out = jnp.zeros((b, c, n, ntf), jnp.float32) + p["bt"][0]
    for k in range(ks):
        out = out + jnp.einsum("bcni,io->bcno", h_pad[:, k:k + c], p["wt"][k])
    h_res = jnp.einsum("bcni,io->bcno", x, p["wr"]) + p["br"][0]
    y = jax.nn.relu(out + h_res)
    mean = jnp.mean(y, axis=-1, keepdims=True)
    var = jnp.mean((y - mean) ** 2, axis=-1, keepdims=True)
    y = (y - mean) / jnp.sqrt(var + 1e-5)
    return y * p["gamma"][0] + p["beta"][0]


if __name__ == "__main__":
    key = jax.random.PRNGKey(0)
    # b=batch, c=c_in (time steps), n=num_nodes, f=f_in
    b, c, n, f = 2, 8, 16, 4
    ncf, ntf, ks = 16, 16, 3  # num_cheb_filter, num_time_filter, kernel_size

    keys = jax.random.split(key, 16)
    x = jax.random.normal(keys[0], (b, c, n, f), jnp.float32)
    adj = jax.random.normal(keys[1], (n, n), jnp.float32) * 0.1

    params = dict(
        w1=jax.random.uniform(keys[2], (1, n), jnp.float32),
        w2=jax.random.normal(keys[3], (n, f), jnp.float32) * 0.2,
        w3=jax.random.uniform(keys[4], (1, f), jnp.float32),
        be=jax.random.normal(keys[5], (c, c), jnp.float32) * 0.2,
        ve=jax.random.normal(keys[6], (c, c), jnp.float32) * 0.2,
        wp=jax.random.normal(keys[7], (3 * f, ncf // 2), jnp.float32) * 0.2,
        wn=jax.random.normal(keys[8], (3 * f, ncf // 2), jnp.float32) * 0.2,
        wt=jax.random.normal(keys[9], (ks, ncf, ntf), jnp.float32) * 0.1,
        bt=jax.random.normal(keys[10], (1, ntf), jnp.float32) * 0.1,
        wr=jax.random.normal(keys[11], (f, ntf), jnp.float32) * 0.2,
        br=jax.random.normal(keys[12], (1, ntf), jnp.float32) * 0.1,
        gamma=jnp.ones((1, ntf), jnp.float32)
        + 0.1 * jax.random.normal(keys[13], (1, ntf), jnp.float32),
        beta=0.1 * jax.random.normal(keys[14], (1, ntf), jnp.float32),
    )

    fwd = jax.jit(adap_gl_block_a)
    out = jax.block_until_ready(fwd(x, adj, params))

    with jax.default_matmul_precision("highest"):
        ref = jax.block_until_ready(reference_forward(x, adj, params))

    # bf16 MXU operands (f32 accumulation) -> compare at bf16-level tolerance.
    np.testing.assert_allclose(np.asarray(out), np.asarray(ref), rtol=5e-2, atol=5e-2)

    print("KERNEL_OK")
</pallas_src>

<mosaic_0001>
module attributes {stable_mosaic.version = 11 : i64} {
  func.func @_fused_adapgl_kernel(%arg0: i32, %arg1: memref<16x128xbf16, #tpu.memory_space<vmem>>, %arg2: memref<128x16xbf16, #tpu.memory_space<vmem>>, %arg3: memref<128x16xbf16, #tpu.memory_space<vmem>>, %arg4: memref<16x16xf32, #tpu.memory_space<vmem>>, %arg5: memref<16x16xbf16, #tpu.memory_space<vmem>>, %arg6: memref<16x16xf32, #tpu.memory_space<vmem>>, %arg7: memref<128x128xbf16, #tpu.memory_space<vmem>>, %arg8: memref<128x128xbf16, #tpu.memory_space<vmem>>, %arg9: memref<128x256xbf16, #tpu.memory_space<vmem>>, %arg10: memref<256x256xbf16, #tpu.memory_space<vmem>>, %arg11: memref<256x256xbf16, #tpu.memory_space<vmem>>, %arg12: memref<768x256xbf16, #tpu.memory_space<vmem>>, %arg13: memref<128x256xbf16, #tpu.memory_space<vmem>>, %arg14: memref<1x256xf32, #tpu.memory_space<vmem>>, %arg15: memref<3x16x16xbf16, #tpu.memory_space<vmem>>, %arg16: memref<256x256xbf16, #tpu.memory_space<vmem>>, %arg17: memref<1x256xf32, #tpu.memory_space<vmem>>, %arg18: memref<1x256xf32, #tpu.memory_space<vmem>>, %arg19: memref<16x256xf32, #tpu.memory_space<vmem>>) attributes {dimension_semantics = [#tpu.dimension_semantics<parallel>], iteration_bounds = array<i64: 1>, scalar_prefetch = 0 : i64, scratch_operands = 0 : i64, tpu.core_type = #tpu.core_type<tc>, window_params = [{transform_indices = @transform_0, window_bounds = array<i64: 16, 128>}, {pipeline_mode = #tpu.pipeline_mode<synchronous>, transform_indices = @transform_1, window_bounds = array<i64: 128, 16>}, {pipeline_mode = #tpu.pipeline_mode<synchronous>, transform_indices = @transform_2, window_bounds = array<i64: 128, 16>}, {pipeline_mode = #tpu.pipeline_mode<synchronous>, transform_indices = @transform_3, window_bounds = array<i64: 16, 16>}, {pipeline_mode = #tpu.pipeline_mode<synchronous>, transform_indices = @transform_4, window_bounds = array<i64: 16, 16>}, {pipeline_mode = #tpu.pipeline_mode<synchronous>, transform_indices = @transform_5, window_bounds = array<i64: 16, 16>}, {pipeline_mode = #tpu.pipeline_mode<synchronous>, transform_indices = @transform_6, window_bounds = array<i64: 128, 128>}, {pipeline_mode = #tpu.pipeline_mode<synchronous>, transform_indices = @transform_7, window_bounds = array<i64: 128, 128>}, {pipeline_mode = #tpu.pipeline_mode<synchronous>, transform_indices = @transform_8, window_bounds = array<i64: 128, 256>}, {pipeline_mode = #tpu.pipeline_mode<synchronous>, transform_indices = @transform_9, window_bounds = array<i64: 256, 256>}, {pipeline_mode = #tpu.pipeline_mode<synchronous>, transform_indices = @transform_10, window_bounds = array<i64: 256, 256>}, {pipeline_mode = #tpu.pipeline_mode<synchronous>, transform_indices = @transform_11, window_bounds = array<i64: 768, 256>}, {pipeline_mode = #tpu.pipeline_mode<synchronous>, transform_indices = @transform_12, window_bounds = array<i64: 128, 256>}, {pipeline_mode = #tpu.pipeline_mode<synchronous>, transform_indices = @transform_13, window_bounds = array<i64: 1, 256>}, {pipeline_mode = #tpu.pipeline_mode<synchronous>, transform_indices = @transform_14, window_bounds = array<i64: 3, 16, 16>}, {pipeline_mode = #tpu.pipeline_mode<synchronous>, transform_indices = @transform_15, window_bounds = array<i64: 256, 256>}, {pipeline_mode = #tpu.pipeline_mode<synchronous>, transform_indices = @transform_16, window_bounds = array<i64: 1, 256>}, {pipeline_mode = #tpu.pipeline_mode<synchronous>, transform_indices = @transform_17, window_bounds = array<i64: 1, 256>}, {transform_indices = @transform_18, window_bounds = array<i64: 16, 256>}]} {
    %c0 = arith.constant 0 : index
    %c0_0 = arith.constant 0 : index
    %0 = vector.load %arg1[%c0, %c0_0] : memref<16x128xbf16, #tpu.memory_space<vmem>>, vector<16x128xbf16>
    %c0_1 = arith.constant 0 : index
    %c0_2 = arith.constant 0 : index
    %1 = vector.load %arg2[%c0_1, %c0_2] : memref<128x16xbf16, #tpu.memory_space<vmem>>, vector<128x16xbf16>
    %cst = arith.constant dense<0.000000e+00> : vector<16x16xf32>
    %2 = tpu.matmul %0, %1, %cst {dimension_numbers = #tpu.dot_dimension_numbers<[1], [0], [0], [1], [0, 0, 1, 1], [], []>} : vector<16x128xbf16>, vector<128x16xbf16>, vector<16x16xf32> -> vector<16x16xf32>
    %c0_3 = arith.constant 0 : index
    %c0_4 = arith.constant 0 : index
    %3 = vector.load %arg3[%c0_3, %c0_4] : memref<128x16xbf16, #tpu.memory_space<vmem>>, vector<128x16xbf16>
    %cst_5 = arith.constant dense<0.000000e+00> : vector<16x16xf32>
    %4 = tpu.matmul %0, %3, %cst_5 {dimension_numbers = #tpu.dot_dimension_numbers<[1], [0], [0], [1], [0, 0, 1, 1], [], []>} : vector<16x128xbf16>, vector<128x16xbf16>, vector<16x16xf32> -> vector<16x16xf32>
    %5 = arith.truncf %2 : vector<16x16xf32> to vector<16x16xbf16>
    %6 = arith.truncf %4 : vector<16x16xf32> to vector<16x16xbf16>
    %cst_6 = arith.constant dense<0.000000e+00> : vector<16x16xf32>
    %7 = tpu.matmul %5, %6, %cst_6 {dimension_numbers = #tpu.dot_dimension_numbers<[1], [1], [0], [0], [0, 0, 1, 0], [], []>} : vector<16x16xbf16>, vector<16x16xbf16>, vector<16x16xf32> -> vector<16x16xf32>
    %c0_7 = arith.constant 0 : index
    %c0_8 = arith.constant 0 : index
    %8 = vector.load %arg4[%c0_7, %c0_8] : memref<16x16xf32, #tpu.memory_space<vmem>>, vector<16x16xf32>
    %9 = arith.addf %7, %8 : vector<16x16xf32>
    %cst_9 = arith.constant 5.000000e-01 : f32
    %10 = vector.broadcast %cst_9 : f32 to vector<16x16xf32>
    %11 = arith.mulf %10, %9 : vector<16x16xf32>
    %12 = math.tanh %11 : vector<16x16xf32>
    %cst_10 = arith.constant 1.000000e+00 : f32
    %13 = vector.broadcast %cst_10 : f32 to vector<16x16xf32>
    %14 = arith.addf %12, %13 : vector<16x16xf32>
    %cst_11 = arith.constant 5.000000e-01 : f32
    %15 = vector.broadcast %cst_11 : f32 to vector<16x16xf32>
    %16 = arith.mulf %15, %14 : vector<16x16xf32>
    %c0_12 = arith.constant 0 : index
    %c0_13 = arith.constant 0 : index
    %17 = vector.load %arg5[%c0_12, %c0_13] : memref<16x16xbf16, #tpu.memory_space<vmem>>, vector<16x16xbf16>
    %18 = arith.truncf %16 : vector<16x16xf32> to vector<16x16xbf16>
    %cst_14 = arith.constant dense<0.000000e+00> : vector<16x16xf32>
    %19 = tpu.matmul %17, %18, %cst_14 {dimension_numbers = #tpu.dot_dimension_numbers<[1], [0], [0], [1], [0, 0, 1, 1], [], []>} : vector<16x16xbf16>, vector<16x16xbf16>, vector<16x16xf32> -> vector<16x16xf32>
    %c0_15 = arith.constant 0 : index
    %c0_16 = arith.constant 0 : index
    %20 = vector.load %arg6[%c0_15, %c0_16] : memref<16x16xf32, #tpu.memory_space<vmem>>, vector<16x16xf32>
    %21 = arith.addf %19, %20 : vector<16x16xf32>
    %cst_17 = arith.constant dense<0xFF800000> : vector<16xf32>
    %22 = vector.multi_reduction <maximumf>, %21, %cst_17 [1] : vector<16x16xf32> to vector<16xf32>
    %23 = vector.shape_cast %22 : vector<16xf32> to vector<16x1xf32>
    %24 = vector.broadcast %23 : vector<16x1xf32> to vector<16x16xf32>
    %25 = arith.subf %21, %24 : vector<16x16xf32>
    %26 = math.exp %25 : vector<16x16xf32>
    %cst_18 = arith.constant dense<0.000000e+00> : vector<16xf32>
    %27 = vector.multi_reduction <add>, %26, %cst_18 [1] : vector<16x16xf32> to vector<16xf32>
    %28 = vector.shape_cast %27 : vector<16xf32> to vector<16x1xf32>
    %29 = tpu.reciprocal %28 {approx = true} : vector<16x1xf32> -> vector<16x1xf32>
    %30 = vector.broadcast %29 : vector<16x1xf32> to vector<16x16xf32>
    %31 = arith.mulf %26, %30 : vector<16x16xf32>
    %32 = arith.truncf %31 : vector<16x16xf32> to vector<16x16xbf16>
    %cst_19 = arith.constant dense<0.000000e+00> : vector<16x128xf32>
    %33 = tpu.matmul %32, %0, %cst_19 {dimension_numbers = #tpu.dot_dimension_numbers<[1], [0], [0], [1], [0, 0, 1, 1], [], []>} : vector<16x16xbf16>, vector<16x128xbf16>, vector<16x128xf32> -> vector<16x128xf32>
    %c0_20 = arith.constant 0 : index
    %c0_21 = arith.constant 0 : index
    %34 = vector.load %arg7[%c0_20, %c0_21] : memref<128x128xbf16, #tpu.memory_space<vmem>>, vector<128x128xbf16>
    %c0_22 = arith.constant 0 : index
    %c0_23 = arith.constant 0 : index
    %35 = vector.load %arg8[%c0_22, %c0_23] : memref<128x128xbf16, #tpu.memory_space<vmem>>, vector<128x128xbf16>
    %36 = arith.truncf %33 : vector<16x128xf32> to vector<16x128xbf16>
    %cst_24 = arith.constant dense<0.000000e+00> : vector<16x128xf32>
    %37 = tpu.matmul %36, %34, %cst_24 {dimension_numbers = #tpu.dot_dimension_numbers<[1], [0], [0], [1], [0, 0, 1, 1], [], []>} : vector<16x128xbf16>, vector<128x128xbf16>, vector<16x128xf32> -> vector<16x128xf32>
    %38 = arith.truncf %33 : vector<16x128xf32> to vector<16x128xbf16>
    %cst_25 = arith.constant dense<0.000000e+00> : vector<16x128xf32>
    %39 = tpu.matmul %38, %35, %cst_25 {dimension_numbers = #tpu.dot_dimension_numbers<[1], [0], [0], [1], [0, 0, 1, 1], [], []>} : vector<16x128xbf16>, vector<128x128xbf16>, vector<16x128xf32> -> vector<16x128xf32>
    %40 = arith.truncf %37 : vector<16x128xf32> to vector<16x128xbf16>
    %cst_26 = arith.constant dense<0.000000e+00> : vector<16x128xf32>
    %41 = tpu.matmul %40, %34, %cst_26 {dimension_numbers = #tpu.dot_dimension_numbers<[1], [0], [0], [1], [0, 0, 1, 1], [], []>} : vector<16x128xbf16>, vector<128x128xbf16>, vector<16x128xf32> -> vector<16x128xf32>
    %cst_27 = arith.constant 2.000000e+00 : f32
    %42 = vector.broadcast %cst_27 : f32 to vector<16x128xf32>
    %43 = arith.mulf %42, %41 : vector<16x128xf32>
    %44 = arith.subf %43, %33 : vector<16x128xf32>
    %45 = arith.truncf %39 : vector<16x128xf32> to vector<16x128xbf16>
    %cst_28 = arith.constant dense<0.000000e+00> : vector<16x128xf32>
    %46 = tpu.matmul %45, %35, %cst_28 {dimension_numbers = #tpu.dot_dimension_numbers<[1], [0], [0], [1], [0, 0, 1, 1], [], []>} : vector<16x128xbf16>, vector<128x128xbf16>, vector<16x128xf32> -> vector<16x128xf32>
    %cst_29 = arith.constant 2.000000e+00 : f32
    %47 = vector.broadcast %cst_29 : f32 to vector<16x128xf32>
    %48 = arith.mulf %47, %46 : vector<16x128xf32>
    %49 = arith.subf %48, %33 : vector<16x128xf32>
    %50 = tpu.concatenate %37, %39 in 1 : vector<16x128xf32>, vector<16x128xf32> -> vector<16x256xf32>
    %51 = tpu.concatenate %44, %49 in 1 : vector<16x128xf32>, vector<16x128xf32> -> vector<16x256xf32>
    %c0_30 = arith.constant 0 : index
    %c0_31 = arith.constant 0 : index
    %52 = vector.load %arg9[%c0_30, %c0_31] : memref<128x256xbf16, #tpu.memory_space<vmem>>, vector<128x256xbf16>
    %53 = arith.truncf %33 : vector<16x128xf32> to vector<16x128xbf16>
    %cst_32 = arith.constant dense<0.000000e+00> : vector<16x256xf32>
    %54 = tpu.matmul %53, %52, %cst_32 {dimension_numbers = #tpu.dot_dimension_numbers<[1], [0], [0], [1], [0, 0, 1, 1], [], []>} : vector<16x128xbf16>, vector<128x256xbf16>, vector<16x256xf32> -> vector<16x256xf32>
    %c0_33 = arith.constant 0 : index
    %c0_34 = arith.constant 0 : index
    %55 = vector.load %arg10[%c0_33, %c0_34] : memref<256x256xbf16, #tpu.memory_space<vmem>>, vector<256x256xbf16>
    %56 = arith.truncf %50 : vector<16x256xf32> to vector<16x256xbf16>
    %cst_35 = arith.constant dense<0.000000e+00> : vector<16x256xf32>
    %57 = tpu.matmul %56, %55, %cst_35 {dimension_numbers = #tpu.dot_dimension_numbers<[1], [0], [0], [1], [0, 0, 1, 1], [], []>} : vector<16x256xbf16>, vector<256x256xbf16>, vector<16x256xf32> -> vector<16x256xf32>
    %58 = arith.addf %54, %57 : vector<16x256xf32>
    %c0_36 = arith.constant 0 : index
    %c0_37 = arith.constant 0 : index
    %59 = vector.load %arg11[%c0_36, %c0_37] : memref<256x256xbf16, #tpu.memory_space<vmem>>, vector<256x256xbf16>
    %60 = arith.truncf %51 : vector<16x256xf32> to vector<16x256xbf16>
    %cst_38 = arith.constant dense<0.000000e+00> : vector<16x256xf32>
    %61 = tpu.matmul %60, %59, %cst_38 {dimension_numbers = #tpu.dot_dimension_numbers<[1], [0], [0], [1], [0, 0, 1, 1], [], []>} : vector<16x256xbf16>, vector<256x256xbf16>, vector<16x256xf32> -> vector<16x256xf32>
    %62 = arith.addf %58, %61 : vector<16x256xf32>
    %cst_39 = arith.constant 0.000000e+00 : f32
    %63 = vector.broadcast %cst_39 : f32 to vector<16x256xf32>
    %64 = arith.maximumf %62, %63 : vector<16x256xf32>
    %c0_40 = arith.constant 0 : index
    %c0_41 = arith.constant 0 : index
    %c0_42 = arith.constant 0 : index
    %65 = vector.load %arg15[%c0_40, %c0_41, %c0_42] : memref<3x16x16xbf16, #tpu.memory_space<vmem>>, vector<1x16x16xbf16>
    %66 = vector.shape_cast %65 : vector<1x16x16xbf16> to vector<16x16xbf16>
    %67 = arith.truncf %64 : vector<16x256xf32> to vector<16x256xbf16>
    %cst_43 = arith.constant dense<0.000000e+00> : vector<16x256xf32>
    %68 = tpu.matmul %66, %67, %cst_43 {dimension_numbers = #tpu.dot_dimension_numbers<[1], [0], [0], [1], [0, 0, 1, 1], [], []>} : vector<16x16xbf16>, vector<16x256xbf16>, vector<16x256xf32> -> vector<16x256xf32>
    %c1 = arith.constant 1 : index
    %c0_44 = arith.constant 0 : index
    %c0_45 = arith.constant 0 : index
    %69 = vector.load %arg15[%c1, %c0_44, %c0_45] : memref<3x16x16xbf16, #tpu.memory_space<vmem>>, vector<1x16x16xbf16>
    %70 = vector.shape_cast %69 : vector<1x16x16xbf16> to vector<16x16xbf16>
    %71 = arith.truncf %64 : vector<16x256xf32> to vector<16x256xbf16>
    %cst_46 = arith.constant dense<0.000000e+00> : vector<16x256xf32>
    %72 = tpu.matmul %70, %71, %cst_46 {dimension_numbers = #tpu.dot_dimension_numbers<[1], [0], [0], [1], [0, 0, 1, 1], [], []>} : vector<16x16xbf16>, vector<16x256xbf16>, vector<16x256xf32> -> vector<16x256xf32>
    %c2 = arith.constant 2 : index
    %c0_47 = arith.constant 0 : index
    %c0_48 = arith.constant 0 : index
    %73 = vector.load %arg15[%c2, %c0_47, %c0_48] : memref<3x16x16xbf16, #tpu.memory_space<vmem>>, vector<1x16x16xbf16>
    %74 = vector.shape_cast %73 : vector<1x16x16xbf16> to vector<16x16xbf16>
    %75 = arith.truncf %64 : vector<16x256xf32> to vector<16x256xbf16>
    %cst_49 = arith.constant dense<0.000000e+00> : vector<16x256xf32>
    %76 = tpu.matmul %74, %75, %cst_49 {dimension_numbers = #tpu.dot_dimension_numbers<[1], [0], [0], [1], [0, 0, 1, 1], [], []>} : vector<16x16xbf16>, vector<16x256xbf16>, vector<16x256xf32> -> vector<16x256xf32>
    %77 = tpu.concatenate %68, %72, %76 in 1 : vector<16x256xf32>, vector<16x256xf32>, vector<16x256xf32> -> vector<16x768xf32>
    %c0_50 = arith.constant 0 : index
    %c0_51 = arith.constant 0 : index
    %78 = vector.load %arg12[%c0_50, %c0_51] : memref<768x256xbf16, #tpu.memory_space<vmem>>, vector<768x256xbf16>
    %79 = arith.truncf %77 : vector<16x768xf32> to vector<16x768xbf16>
    %cst_52 = arith.constant dense<0.000000e+00> : vector<16x256xf32>
    %80 = tpu.matmul %79, %78, %cst_52 {dimension_numbers = #tpu.dot_dimension_numbers<[1], [0], [0], [1], [0, 0, 1, 1], [], []>} : vector<16x768xbf16>, vector<768x256xbf16>, vector<16x256xf32> -> vector<16x256xf32>
    %c0_53 = arith.constant 0 : index
    %c0_54 = arith.constant 0 : index
    %81 = vector.load %arg13[%c0_53, %c0_54] : memref<128x256xbf16, #tpu.memory_space<vmem>>, vector<128x256xbf16>
    %cst_55 = arith.constant dense<0.000000e+00> : vector<16x256xf32>
    %82 = tpu.matmul %0, %81, %cst_55 {dimension_numbers = #tpu.dot_dimension_numbers<[1], [0], [0], [1], [0, 0, 1, 1], [], []>} : vector<16x128xbf16>, vector<128x256xbf16>, vector<16x256xf32> -> vector<16x256xf32>
    %83 = arith.addf %80, %82 : vector<16x256xf32>
    %c0_56 = arith.constant 0 : index
    %c0_57 = arith.constant 0 : index
    %84 = vector.load %arg14[%c0_56, %c0_57] : memref<1x256xf32, #tpu.memory_space<vmem>>, vector<1x256xf32>
    %85 = vector.broadcast %84 : vector<1x256xf32> to vector<16x256xf32>
    %86 = arith.addf %83, %85 : vector<16x256xf32>
    %cst_58 = arith.constant 0.000000e+00 : f32
    %87 = vector.broadcast %cst_58 : f32 to vector<16x256xf32>
    %88 = arith.maximumf %86, %87 : vector<16x256xf32>
    %89 = arith.mulf %88, %88 : vector<16x256xf32>
    %90 = tpu.concatenate %88, %89 in 0 : vector<16x256xf32>, vector<16x256xf32> -> vector<32x256xf32>
    %c0_59 = arith.constant 0 : index
    %c0_60 = arith.constant 0 : index
    %91 = vector.load %arg16[%c0_59, %c0_60] : memref<256x256xbf16, #tpu.memory_space<vmem>>, vector<256x256xbf16>
    %92 = arith.truncf %90 : vector<32x256xf32> to vector<32x256xbf16>
    %cst_61 = arith.constant dense<0.000000e+00> : vector<32x256xf32>
    %93 = tpu.matmul %92, %91, %cst_61 {dimension_numbers = #tpu.dot_dimension_numbers<[1], [0], [0], [1], [0, 0, 1, 1], [], []>} : vector<32x256xbf16>, vector<256x256xbf16>, vector<32x256xf32> -> vector<32x256xf32>
    %94 = vector.extract_strided_slice %93 {offsets = [0, 0], sizes = [16, 256], strides = [1, 1]} : vector<32x256xf32> to vector<16x256xf32>
    %95 = vector.extract_strided_slice %93 {offsets = [16, 0], sizes = [16, 256], strides = [1, 1]} : vector<32x256xf32> to vector<16x256xf32>
    %96 = arith.mulf %94, %94 : vector<16x256xf32>
    %97 = arith.subf %95, %96 : vector<16x256xf32>
    %cst_62 = arith.constant 0.000000e+00 : f32
    %98 = vector.broadcast %cst_62 : f32 to vector<16x256xf32>
    %99 = arith.maximumf %97, %98 : vector<16x256xf32>
    %100 = arith.subf %88, %94 : vector<16x256xf32>
    %cst_63 = arith.constant 9.99999974E-6 : f32
    %101 = vector.broadcast %cst_63 : f32 to vector<16x256xf32>
    %102 = arith.addf %99, %101 : vector<16x256xf32>
    %103 = math.rsqrt %102 : vector<16x256xf32>
    %104 = arith.mulf %100, %103 : vector<16x256xf32>
    %c0_64 = arith.constant 0 : index
    %c0_65 = arith.constant 0 : index
    %105 = vector.load %arg17[%c0_64, %c0_65] : memref<1x256xf32, #tpu.memory_space<vmem>>, vector<1x256xf32>
    %106 = vector.broadcast %105 : vector<1x256xf32> to vector<16x256xf32>
    %107 = arith.mulf %104, %106 : vector<16x256xf32>
    %c0_66 = arith.constant 0 : index
    %c0_67 = arith.constant 0 : index
    %108 = vector.load %arg18[%c0_66, %c0_67] : memref<1x256xf32, #tpu.memory_space<vmem>>, vector<1x256xf32>
    %109 = vector.broadcast %108 : vector<1x256xf32> to vector<16x256xf32>
    %110 = arith.addf %107, %109 : vector<16x256xf32>
    %c0_68 = arith.constant 0 : index
    %c0_69 = arith.constant 0 : index
    %111 = vector.load %arg19[%c0_68, %c0_69] : memref<16x256xf32, #tpu.memory_space<vmem>>, vector<16x256xf32>
    tpu.vector_store %arg19[%c0_68, %c0_69], %110 {strides = array<i32>} : memref<16x256xf32, #tpu.memory_space<vmem>>, vector<16x256xf32>,
    return
  }
  func.func @transform_0(%arg0: i32) -> (i32, i32) {
    %c0_i32 = arith.constant 0 : i32
    %c0_i32_0 = arith.constant 0 : i32
    return %arg0, %c0_i32 : i32, i32
  }
  func.func @transform_1(%arg0: i32) -> (i32, i32) {
    %c0_i32 = arith.constant 0 : i32
    %c0_i32_0 = arith.constant 0 : i32
    %c0_i32_1 = arith.constant 0 : i32
    return %c0_i32, %c0_i32_0 : i32, i32
  }
  func.func @transform_2(%arg0: i32) -> (i32, i32) {
    %c0_i32 = arith.constant 0 : i32
    %c0_i32_0 = arith.constant 0 : i32
    %c0_i32_1 = arith.constant 0 : i32
    return %c0_i32, %c0_i32_0 : i32, i32
  }
  func.func @transform_3(%arg0: i32) -> (i32, i32) {
    %c0_i32 = arith.constant 0 : i32
    %c0_i32_0 = arith.constant 0 : i32
    %c0_i32_1 = arith.constant 0 : i32
    return %c0_i32, %c0_i32_0 : i32, i32
  }
  func.func @transform_4(%arg0: i32) -> (i32, i32) {
    %c0_i32 = arith.constant 0 : i32
    %c0_i32_0 = arith.constant 0 : i32
    %c0_i32_1 = arith.constant 0 : i32
    return %c0_i32, %c0_i32_0 : i32, i32
  }
  func.func @transform_5(%arg0: i32) -> (i32, i32) {
    %c0_i32 = arith.constant 0 : i32
    %c0_i32_0 = arith.constant 0 : i32
    %c0_i32_1 = arith.constant 0 : i32
    return %c0_i32, %c0_i32_0 : i32, i32
  }
  func.func @transform_6(%arg0: i32) -> (i32, i32) {
    %c0_i32 = arith.constant 0 : i32
    %c0_i32_0 = arith.constant 0 : i32
    %c0_i32_1 = arith.constant 0 : i32
    return %c0_i32, %c0_i32_0 : i32, i32
  }
  func.func @transform_7(%arg0: i32) -> (i32, i32) {
    %c0_i32 = arith.constant 0 : i32
    %c0_i32_0 = arith.constant 0 : i32
    %c0_i32_1 = arith.constant 0 : i32
    return %c0_i32, %c0_i32_0 : i32, i32
  }
  func.func @transform_8(%arg0: i32) -> (i32, i32) {
    %c0_i32 = arith.constant 0 : i32
    %c0_i32_0 = arith.constant 0 : i32
    %c0_i32_1 = arith.constant 0 : i32
    return %c0_i32, %c0_i32_0 : i32, i32
  }
  func.func @transform_9(%arg0: i32) -> (i32, i32) {
    %c0_i32 = arith.constant 0 : i32
    %c0_i32_0 = arith.constant 0 : i32
    %c0_i32_1 = arith.constant 0 : i32
    return %c0_i32, %c0_i32_0 : i32, i32
  }
  func.func @transform_10(%arg0: i32) -> (i32, i32) {
    %c0_i32 = arith.constant 0 : i32
    %c0_i32_0 = arith.constant 0 : i32
    %c0_i32_1 = arith.constant 0 : i32
    return %c0_i32, %c0_i32_0 : i32, i32
  }
  func.func @transform_11(%arg0: i32) -> (i32, i32) {
    %c0_i32 = arith.constant 0 : i32
    %c0_i32_0 = arith.constant 0 : i32
    %c0_i32_1 = arith.constant 0 : i32
    return %c0_i32, %c0_i32_0 : i32, i32
  }
  func.func @transform_12(%arg0: i32) -> (i32, i32) {
    %c0_i32 = arith.constant 0 : i32
    %c0_i32_0 = arith.constant 0 : i32
    %c0_i32_1 = arith.constant 0 : i32
    return %c0_i32, %c0_i32_0 : i32, i32
  }
  func.func @transform_13(%arg0: i32) -> (i32, i32) {
    %c0_i32 = arith.constant 0 : i32
    %c0_i32_0 = arith.constant 0 : i32
    %c0_i32_1 = arith.constant 0 : i32
    return %c0_i32, %c0_i32_0 : i32, i32
  }
  func.func @transform_14(%arg0: i32) -> (i32, i32, i32) {
    %c0_i32 = arith.constant 0 : i32
    %c0_i32_0 = arith.constant 0 : i32
    %c0_i32_1 = arith.constant 0 : i32
    %c0_i32_2 = arith.constant 0 : i32
    return %c0_i32, %c0_i32_0, %c0_i32_1 : i32, i32, i32
  }
  func.func @transform_15(%arg0: i32) -> (i32, i32) {
    %c0_i32 = arith.constant 0 : i32
    %c0_i32_0 = arith.constant 0 : i32
    %c0_i32_1 = arith.constant 0 : i32
    return %c0_i32, %c0_i32_0 : i32, i32
  }
  func.func @transform_16(%arg0: i32) -> (i32, i32) {
    %c0_i32 = arith.constant 0 : i32
    %c0_i32_0 = arith.constant 0 : i32
    %c0_i32_1 = arith.constant 0 : i32
    return %c0_i32, %c0_i32_0 : i32, i32
  }
  func.func @transform_17(%arg0: i32) -> (i32, i32) {
    %c0_i32 = arith.constant 0 : i32
    %c0_i32_0 = arith.constant 0 : i32
    %c0_i32_1 = arith.constant 0 : i32
    return %c0_i32, %c0_i32_0 : i32, i32
  }
  func.func @transform_18(%arg0: i32) -> (i32, i32) {
    %c0_i32 = arith.constant 0 : i32
    %c0_i32_0 = arith.constant 0 : i32
    return %arg0, %c0_i32 : i32, i32
  }
}

</mosaic_0001>

<bundles_post_ra>
// kernel: tile.23
= control target key start
LH: loop header
LB: loop body
LE: loop exit
PB: predicated region body
PF: predicated region fallthrough
CT: control target
= control target key end

     0   :  { %s154_s0 = inlined_call_operand.vmem [shape: f32[8,8], index: 0, kind: input, shape index: {}]   ;;  %s155_s1 = inlined_call_operand.vmem [shape: f32[2,8,2,8], index: 1, kind: output, shape index: {}]  }
   0x1   :  { %v4_v0 = vld [vmem:[%s154_s0] ss:$0 sm:$0xff]  ;;  %v51_v1 = vld [vmem:[%s154_s0 + $0x1] ss:$0 sm:$0xff]  ;;  %v54_v2 = vld [vmem:[%s154_s0 + $0x2] ss:$0 sm:$0xff] }
   0x2   :  { %5 = vst [vmem:[%s155_s1] sm:$0x3] %v4_v0  ;;  %v57_v3 = vld [vmem:[%s154_s0 + $0x3] ss:$0 sm:$0xff]  ;;  %v60_v4 = vld [vmem:[%s154_s0 + $0x4] ss:$0 sm:$0xff] }
   0x3   :  { %50 = vst [vmem:[%s155_s1 + $0x10] sm:$0x3] %v4_v0  ;;  %v63_v5 = vld [vmem:[%s154_s0 + $0x5] ss:$0 sm:$0xff]  ;;  %v66_v6 = vld [vmem:[%s154_s0 + $0x6] ss:$0 sm:$0xff] }
   0x4   :  { %52 = vst [vmem:[%s155_s1 + $0x2] sm:$0x3] %v51_v1  ;;  %v69_v7 = vld [vmem:[%s154_s0 + $0x7] ss:$0 sm:$0xff] }
   0x5   :  { %53 = vst [vmem:[%s155_s1 + $0x12] sm:$0x3] %v51_v1 }
   0x6   :  { %55 = vst [vmem:[%s155_s1 + $0x4] sm:$0x3] %v54_v2 }
   0x7   :  { %56 = vst [vmem:[%s155_s1 + $0x14] sm:$0x3] %v54_v2 }
   0x8   :  { %58 = vst [vmem:[%s155_s1 + $0x6] sm:$0x3] %v57_v3 }
   0x9   :  { %59 = vst [vmem:[%s155_s1 + $0x16] sm:$0x3] %v57_v3 }
   0xa   :  { %61 = vst [vmem:[%s155_s1 + $0x8] sm:$0x3] %v60_v4 }
   0xb   :  { %62 = vst [vmem:[%s155_s1 + $0x18] sm:$0x3] %v60_v4 }
   0xc   :  { %64 = vst [vmem:[%s155_s1 + $0xa] sm:$0x3] %v63_v5 }
   0xd   :  { %65 = vst [vmem:[%s155_s1 + $0x1a] sm:$0x3] %v63_v5 }
   0xe   :  { %67 = vst [vmem:[%s155_s1 + $0xc] sm:$0x3] %v66_v6 }
   0xf   :  { %68 = vst [vmem:[%s155_s1 + $0x1c] sm:$0x3] %v66_v6 }
  0x10   :  { %70 = vst [vmem:[%s155_s1 + $0xe] sm:$0x3] %v69_v7 }
  0x11   :  { %71 = vst [vmem:[%s155_s1 + $0x1e] sm:$0x3] %v69_v7 }

// kernel: adap_gl_block_a.1
= control target key start
LH: loop header
LB: loop body
LE: loop exit
PB: predicated region body
PF: predicated region fallthrough
CT: control target
= control target key end

     0   :  { %vm228_vm0 = vcmask 130048   ;;  %s5551_s1 = inlined_call_operand.vmem [shape: bf16[128,16], index: 1, kind: input, shape index: {}]   ;;  %s5552_s2 = inlined_call_operand.vmem [shape: bf16[128,16], index: 2, kind: input, shape index: {}]   ;;  %s5553_s0 = inlined_call_operand.vmem [shape: bf16[16,128], index: 0, kind: input, shape index: {}]   ;;  %s5554_s3 = inlined_call_operand.vmem [shape: f32[16,16], index: 3, kind: input, shape index: {}]   ;;  %s5555_s4 = inlined_call_operand.vmem [shape: bf16[16,16], index: 4, kind: input, shape index: {}]   ;;  %s5556_s5 = inlined_call_operand.vmem [shape: f32[16,16], index: 5, kind: input, shape index: {}]   ;;  %s5557_s6 = inlined_call_operand.vmem [shape: bf16[128,128], index: 6, kind: input, shape index: {}]   ;;  %s5558_s7 = inlined_call_operand.vmem [shape: bf16[128,128], index: 7, kind: input, shape index: {}]   ;;  %s5559_s9 = inlined_call_operand.vmem [shape: bf16[256,256], index: 9, kind: input, shape index: {}]   ;;  %s5560_s8 = inlined_call_operand.vmem [shape: bf16[128,256], index: 8, kind: input, shape index: {}]   ;;  %s5561_s10 = inlined_call_operand.vmem [shape: bf16[256,256], index: 10, kind: input, shape index: {}]   ;;  %s5562_s14 = inlined_call_operand.vmem [shape: bf16[3,16,16], index: 14, kind: input, shape index: {}]   ;;  %s5563_s12 = inlined_call_operand.vmem [shape: bf16[128,256], index: 12, kind: input, shape index: {}]   ;;  %s5564_s11 = inlined_call_operand.vmem [shape: bf16[768,256], index: 11, kind: input, shape index: {}]   ;;  %s5565_s15 = inlined_call_operand.vmem [shape: bf16[256,256], index: 15, kind: input, shape index: {}]   ;;  %s5566_s13 = inlined_call_operand.vmem [shape: f32[1,256], index: 13, kind: input, shape index: {}]   ;;  %s5567_s16 = inlined_call_operand.vmem [shape: f32[1,256], index: 16, kind: input, shape index: {}]   ;;  %s5568_s17 = inlined_call_operand.vmem [shape: f32[1,256], index: 17, kind: input, shape index: {}]   ;;  %s5569_s18 = inlined_call_operand.vmem [shape: f32[16,256], index: 18, kind: output, shape index: {}]  }
   0x1   :  { %5574 = sst [smem:[#allocation2_spill]] %s5551_s1  ;;  %v226_v24 = vld [vmem:[%s5554_s3] sm:$0xff]  ;;  %v227_v28 = vld [vmem:[%s5554_s3 + $0x8] sm:$0xff]  ;;  %v3605_v58 = vld [vmem:[%s5557_s6 + $0x38] sm:$0xff] }
   0x2   :  { %5575 = sst [smem:[#allocation3_spill]] %s5552_s2  ;;  %v3597_v39 = vld [vmem:[%s5555_s4] sm:$0xff]  ;;  %v261_v44 = vld [vmem:[%s5556_s5 + $0x8] sm:$0xff]  ;;  %v3613_v59 = vld [vmem:[%s5558_s7 + $0x38] sm:$0xff] }
   0x3   :  { %5576 = sst [smem:[#allocation4_spill]] %s5553_s0  ;;  %v260_v40 = vld [vmem:[%s5556_s5] sm:$0xff]  ;;  %v3604_v60 = vld [vmem:[%s5557_s6 + $0x30] sm:$0xff]  ;;  %v3603_v62 = vld [vmem:[%s5557_s6 + $0x28] sm:$0xff] }
   0x4   :  { %5577 = sst [smem:[#allocation5_spill]] %s5564_s11  ;;  %v3612_v61 = vld [vmem:[%s5558_s7 + $0x30] sm:$0xff]  ;;  %v3611_v63 = vld [vmem:[%s5558_s7 + $0x28] sm:$0xff] }
   0x5   :  { %s5578_s29 = sld [smem:[#allocation2_spill]] }
   0x6   :  { %s5579_s11 = sld [smem:[#allocation3_spill]] }
   0x7   :  { %s5580_s20 = sld [smem:[#allocation4_spill]] }
   0xb   :  { %v3588_v0 = vld [vmem:[%s5578_s29 + $0x38] sm:$0xff]  ;;  %v3587_v2 = vld [vmem:[%s5578_s29 + $0x30] sm:$0xff]  ;;  %v3586_v4 = vld [vmem:[%s5578_s29 + $0x28] sm:$0xff] }
   0xc   :  { %v3596_v1 = vld [vmem:[%s5579_s11 + $0x38] sm:$0xff]  ;;  %132 = vmatpush.bf16.msra.mxu0 %v3588_v0  ;;  %v3595_v3 = vld [vmem:[%s5579_s11 + $0x30] sm:$0xff]  ;;  %v3594_v5 = vld [vmem:[%s5579_s11 + $0x28] sm:$0xff] }
   0xd   :  { %210 = vmatpush.bf16.msra.mxu1 %v3596_v1  ;;  %v3585_v6 = vld [vmem:[%s5578_s29 + $0x20] sm:$0xff]  ;;  %v3584_v8 = vld [vmem:[%s5578_s29 + $0x18] sm:$0xff]  ;;  %v3583_v10 = vld [vmem:[%s5578_s29 + $0x10] sm:$0xff] }
   0xe   :  { %v3593_v7 = vld [vmem:[%s5579_s11 + $0x20] sm:$0xff]  ;;  %v3592_v9 = vld [vmem:[%s5579_s11 + $0x18] sm:$0xff]  ;;  %v3591_v11 = vld [vmem:[%s5579_s11 + $0x10] sm:$0xff] }
   0xf   :  { %v3582_v12 = vld [vmem:[%s5578_s29 + $0x8] sm:$0xff]  ;;  %v3581_v14 = vld [vmem:[%s5578_s29] sm:$0xff] }
  0x10   :  { %133 = vmatpush.bf16.msra.mxu0 %v3587_v2  ;;  %v3590_v13 = vld [vmem:[%s5579_s11 + $0x8] sm:$0xff]  ;;  %v3589_v15 = vld [vmem:[%s5579_s11] sm:$0xff] }
  0x11   :  { %211 = vmatpush.bf16.msra.mxu1 %v3595_v3  ;;  %v3580_v16 = vld [vmem:[%s5580_s20] sm:$0xff]  ;;  %v3601_v3 = vld [vmem:[%s5557_s6 + $0x18] sm:$0xff] }
  0x12   :  { %v3602_v0 = vld [vmem:[%s5557_s6 + $0x20] sm:$0xff] }
  0x13   :  { %v3610_v1 = vld [vmem:[%s5558_s7 + $0x20] sm:$0xff] }
  0x14   :  { %134 = vmatpush.bf16.msra.mxu0 %v3586_v4  ;;  %v3609_v4 = vld [vmem:[%s5558_s7 + $0x18] sm:$0xff] }
  0x15   :  { %212 = vmatpush.bf16.msra.mxu1 %v3594_v5 }
  0x18   :  { %135 = vmatpush.bf16.msra.mxu0 %v3585_v6 }
  0x19   :  { %213 = vmatpush.bf16.msra.mxu1 %v3593_v7 }
  0x1c   :  { %136 = vmatpush.bf16.msra.mxu0 %v3584_v8 }
  0x1d   :  { %214 = vmatpush.bf16.msra.mxu1 %v3592_v9 }
  0x20   :  { %137 = vmatpush.bf16.msra.mxu0 %v3583_v10 }
  0x21   :  { %215 = vmatpush.bf16.msra.mxu1 %v3591_v11  ;;  %v3600_v11 = vld [vmem:[%s5557_s6 + $0x10] sm:$0xff] }
  0x24   :  { %138 = vmatpush.bf16.msra.mxu0 %v3582_v12  ;;  %v3608_v12 = vld [vmem:[%s5558_s7 + $0x10] sm:$0xff] }
  0x25   :  { %216 = vmatpush.bf16.msra.mxu1 %v3590_v13  ;;  %v3599_v13 = vld [vmem:[%s5557_s6 + $0x8] sm:$0xff] }
  0x28   :  { %139 = vmatpush.bf16.msra.mxu0 %v3581_v14  ;;  %v3607_v14 = vld [vmem:[%s5558_s7 + $0x8] sm:$0xff] }
  0x29   :  { %217 = vmatpush.bf16.msra.mxu1 %v3589_v15  ;;  %v3598_v15 = vld [vmem:[%s5557_s6] sm:$0xff] }
  0x2b   :  { %140 = vmatmul.bf16.vlgmr.msra.gmra.mxu0 %v3580_v16 }
  0x2c   :  { %218 = vmatmul.bf16.vlgmr.msra.gmra.mxu1 %v3580_v16  ;;  %482 = vmatpush.bf16.msrb.mxu0 %v3605_v58 }
  0x2d   :  { %501 = vmatpush.bf16.msrb.mxu1 %v3613_v59 }
  0x30   :  { %483 = vmatpush.bf16.msrb.mxu0 %v3604_v60 }
  0x31   :  { %502 = vmatpush.bf16.msrb.mxu1 %v3612_v61 }
  0x34   :  { %484 = vmatpush.bf16.msrb.mxu0 %v3603_v62 }
  0x35   :  { %503 = vmatpush.bf16.msrb.mxu1 %v3611_v63 }
  0x38   :  { %485 = vmatpush.bf16.msrb.mxu0 %v3602_v0 }
  0x39   :  { %504 = vmatpush.bf16.msrb.mxu1 %v3610_v1 }
  0x3c   :  { %486 = vmatpush.bf16.msrb.mxu0 %v3601_v3 }
  0x3d   :  { %505 = vmatpush.bf16.msrb.mxu1 %v3609_v4 }
  0x40   :  { %487 = vmatpush.bf16.msrb.mxu0 %v3600_v11 }
  0x41   :  { %506 = vmatpush.bf16.msrb.mxu1 %v3608_v12 }
  0x44   :  { %488 = vmatpush.bf16.msrb.mxu0 %v3599_v13 }
  0x45   :  { %507 = vmatpush.bf16.msrb.mxu1 %v3607_v14 }
  0x48   :  { %489 = vmatpush.bf16.msrb.mxu0 %v3598_v15 }
  0xa8   :  { %v141_v18 = vpop.f32.mrf.mxu0 }
  0xa9   :  { %v219_v17 = vpop.f32.mrf.mxu1 }
  0xb0   :  { %v143_v22 = vpop.f32.mrf.mxu0 }
  0xb1   :  { %v221_v19 = vpop.f32.mrf.mxu1  ;;  %v224_v23 = vpack.c.bf16 %v143_v22, %v141_v18  ;;  %v3645_v18 = vld [vmem:[%s5559_s9 + $0x74] sm:$0xf0]  ;;  %v2712_v22 = vld [vmem:[%s5559_s9 + $0x60] sm:$0xf] }
  0xb2   :  { %v225_v20 = vpack.c.bf16 %v221_v19, %v219_v17  ;;  %v2720_v17 = vld [vmem:[%s5559_s9 + $0x70] sm:$0xf] }
  0xb3   :  { %v2784_v19 = vld [vmem:[%s5559_s9 + $0xf0] sm:$0xf] }
  0xb4   :  { %v233_v21 = vsel %vm228_vm0, %v225_v20, 0  ;;  %v2721_v20 = vor.u32 %v3645_v18, %v2720_v17  ;;  %v2714_v17 = vld [vmem:[%s5559_s9 + $0x68] sm:$0xf0]  ;;  %v3658_v18 = vld [vmem:[%s5559_s9 + $0xe4] sm:$0xf] }
  0xb5   :  { %242 = vmatpush.bf16.xpose.msra.mxu2 %v233_v21  ;;  %v3661_v21 = vld [vmem:[%s5559_s9 + $0xf4] sm:$0xf0] }
  0xbc   :  { %2591 = vmatmul.msk.bf16.vlgmr.msra.gmra.mxu2 %vm228_vm0, %v224_v23  ;;  %v3643_v23 = vld [vmem:[%s5559_s9 + $0x64] sm:$0xf0] }
  0xbd   :  { %405 = vmatpush.bf16.msrb.mxu2 %v3605_v58 }
  0xc1   :  { %406 = vmatpush.bf16.msrb.mxu2 %v3604_v60  ;;  %v3633_v60 = vld [vmem:[%s5559_s9 + $0x14] sm:$0xf0] }
  0xc5   :  { %407 = vmatpush.bf16.msrb.mxu2 %v3603_v62  ;;  %v2736_v62 = vld [vmem:[%s5559_s9 + $0x90] sm:$0xf] }
  0xc9   :  { %408 = vmatpush.bf16.msrb.mxu2 %v3602_v0 }
  0xcd   :  { %409 = vmatpush.bf16.msrb.mxu2 %v3601_v3  ;;  %v3631_v3 = vld [vmem:[%s5559_s9 + $0x4] sm:$0xf0] }
  0xd1   :  { %410 = vmatpush.bf16.msrb.mxu2 %v3600_v11 }
  0xd5   :  { %411 = vmatpush.bf16.msrb.mxu2 %v3599_v13 }
  0xd9   :  { %412 = vmatpush.bf16.msrb.mxu2 %v3598_v15 }
  0xdd   :  { %727 = vmatpush.bf16.msra.mxu2 %v2721_v20  ;;  %v2778_v20 = vld [vmem:[%s5559_s9 + $0xe8] sm:$0xf0] }
 0x13f   :  { %v244_v25 = vpop.f32.mrf.mxu2 }
 0x140   :  { %v245_v26 = vadd.f32 %v244_v25, %v226_v24  ;;  %v2785_v24 = vor.u32 %v3661_v21, %v2784_v19  ;;  %v2776_v25 = vld [vmem:[%s5559_s9 + $0xe0] sm:$0xf] }
 0x141   :  { %v2840_v21 = vld [vmem:[%s5560_s8 + $0x60] sm:$0xf] }
 0x142   :  { %v249_v27 = vmul.f32 0.5, %v245_v26  ;;  %v3659_v26 = vld [vmem:[%s5559_s9 + $0xe4] sm:$0xf0] }
 0x144   :  { %3841 = vtanh.f32 %v249_v27  ;;  %v2713_v27 = vor.u32 %v3643_v23, %v2712_v22  ;;  %v3627_v22 = vld [vmem:[%s5560_s8 + $0x64] sm:$0xf0]  ;;  %v2781_v23 = vor.u32 %v3658_v18, %v2778_v20  ;;  %v2738_v18 = vld [vmem:[%s5559_s9 + $0x98] sm:$0xf0] }
 0x146   :  { %728 = vmatpush.bf16.msra.mxu2 %v2713_v27 }
 0x147   :  { %v246_v29 = vpop.f32.mrf.mxu2 }
 0x148   :  { %v247_v30 = vadd.f32 %v246_v29, %v227_v28  ;;  %v2777_v28 = vor.u32 %v3659_v26, %v2776_v25  ;;  %v2704_v29 = vld [vmem:[%s5559_s9 + $0x50] sm:$0xf]  ;;  %v3626_v25 = vld [vmem:[%s5560_s8 + $0x64] sm:$0xf]  ;;  %v2842_v26 = vld [vmem:[%s5560_s8 + $0x68] sm:$0xf0] }
 0x149   :  { %v2845_v27 = vor.u32 %v3626_v25, %v2842_v26  ;;  %v3630_v26 = vld [vmem:[%s5559_s9 + $0x4] sm:$0xf] }
 0x14a   :  { %v250_v31 = vmul.f32 0.5, %v247_v30  ;;  %v3842_v32 = vpop.eup %3841  ;;  %v3641_v30 = vld [vmem:[%s5559_s9 + $0x54] sm:$0xf0] }
 0x14b   :  { %v253_v33 = vadd.f32 1.0, %v3842_v32  ;;  %v3657_v32 = vld [vmem:[%s5559_s9 + $0xd4] sm:$0xf0] }
 0x14c   :  { %3843 = vtanh.f32 %v250_v31  ;;  %v2768_v31 = vld [vmem:[%s5559_s9 + $0xd0] sm:$0xf] }
 0x14d   :  { %v255_v36 = vmul.f32 0.5, %v253_v33  ;;  %v2705_v33 = vor.u32 %v3641_v30, %v2704_v29  ;;  %v2706_v29 = vld [vmem:[%s5559_s9 + $0x58] sm:$0xf0]  ;;  %v3656_v30 = vld [vmem:[%s5559_s9 + $0xd4] sm:$0xf] }
 0x14f   :  { %729 = vmatpush.bf16.msra.mxu2 %v2705_v33  ;;  %v2832_v33 = vld [vmem:[%s5560_s8 + $0x50] sm:$0xf] }
 0x152   :  { %v3844_v34 = vpop.eup %3843 }
 0x153   :  { %v254_v35 = vadd.f32 1.0, %v3844_v34  ;;  %v2769_v34 = vor.u32 %v3657_v32, %v2768_v31  ;;  %v2770_v32 = vld [vmem:[%s5559_s9 + $0xd8] sm:$0xf0] }
 0x155   :  { %v256_v37 = vmul.f32 0.5, %v254_v35  ;;  %v2696_v35 = vld [vmem:[%s5559_s9 + $0x40] sm:$0xf] }
 0x157   :  { %v259_v38 = vpack.c.bf16 %v256_v37, %v255_v36  ;;  %v3639_v36 = vld [vmem:[%s5559_s9 + $0x44] sm:$0xf0]  ;;  %v2760_v37 = vld [vmem:[%s5559_s9 + $0xc0] sm:$0xf] }
 0x159   :  { %277 = vmatpush.bf16.msra.mxu3 %v259_v38  ;;  %v3655_v38 = vld [vmem:[%s5559_s9 + $0xc4] sm:$0xf0] }
 0x15c   :  { %2596 = vmatmul.msk.bf16.vlgmr.msra.gmra.mxu3 %vm228_vm0, %v3597_v39  ;;  %v3644_v39 = vld [vmem:[%s5559_s9 + $0x74] sm:$0xf] }
 0x15d   :  { %317 = vmatpush.bf16.msrb.mxu3 %v3580_v16  ;;  %v3606_v16 = vld [vmem:[%s5558_s7] sm:$0xff]  ;;  %s5581_s7 = sld [smem:[#allocation5_spill]] }
 0x15e   :  { %508 = vmatpush.bf16.msrb.mxu1 %v3606_v16 }
 0x161   :  { %467 = vmatpush.bf16.msra.mxu3 %v3613_v59  ;;  %v2672_v59 = vld [vmem:[%s5559_s9 + $0x10] sm:$0xf] }
 0x162   :  { %v2673_v0 = vor.u32 %v3633_v60, %v2672_v59 }
 0x165   :  { %468 = vmatpush.bf16.msra.mxu3 %v3612_v61 }
 0x169   :  { %469 = vmatpush.bf16.msra.mxu3 %v3611_v63  ;;  %v3649_v63 = vld [vmem:[%s5559_s9 + $0x94] sm:$0xf0] }
 0x16d   :  { %470 = vmatpush.bf16.msra.mxu3 %v3610_v1  ;;  %v2737_v1 = vor.u32 %v3649_v63, %v2736_v62  ;;  %v3620_v62 = vld [vmem:[%s5560_s8 + $0x34] sm:$0xf]  ;;  %v2818_v63 = vld [vmem:[%s5560_s8 + $0x38] sm:$0xf0] }
 0x171   :  { %471 = vmatpush.bf16.msra.mxu3 %v3609_v4  ;;  %v2728_v4 = vld [vmem:[%s5559_s9 + $0x80] sm:$0xf] }
 0x175   :  { %472 = vmatpush.bf16.msra.mxu3 %v3608_v12 }
 0x179   :  { %473 = vmatpush.bf16.msra.mxu3 %v3607_v14 }
 0x17d   :  { %474 = vmatpush.bf16.msra.mxu3 %v3606_v16  ;;  %v3642_v16 = vld [vmem:[%s5559_s9 + $0x64] sm:$0xf] }
 0x17e   :  { %v2717_v19 = vor.u32 %v3642_v16, %v2714_v17  ;;  %v3648_v17 = vld [vmem:[%s5559_s9 + $0x94] sm:$0xf] }
 0x1df   :  { %v279_v41 = vpop.f32.mrf.mxu3 }
 0x1e0   :  { %v280_v42 = vadd.f32 %v279_v41, %v260_v40  ;;  %v2697_v40 = vor.u32 %v3639_v36, %v2696_v35  ;;  %v2722_v41 = vld [vmem:[%s5559_s9 + $0x78] sm:$0xf0]  ;;  %v2773_v35 = vor.u32 %v3656_v30, %v2770_v32  ;;  %v2730_v30 = vld [vmem:[%s5559_s9 + $0x88] sm:$0xf0]  ;;  %v3615_v32 = vld [vmem:[%s5560_s8 + $0x4] sm:$0xf0] }
 0x1e2   :  { %v284_v43 = vsel %vm228_vm0, %v280_v42, -inf  ;;  %730 = vmatpush.bf16.msra.mxu2 %v2697_v40  ;;  %v3638_v40 = vld [vmem:[%s5559_s9 + $0x44] sm:$0xf] }
 0x1e3   :  { %285 = vmax.xlane.f32.xlu0 %v284_v43  ;;  %v2786_v43 = vld [vmem:[%s5559_s9 + $0xf8] sm:$0xf0] }
 0x1e7   :  { %v281_v45 = vpop.f32.mrf.mxu3 }
 0x1e8   :  { %v282_v46 = vadd.f32 %v281_v45, %v261_v44  ;;  %v2761_v44 = vor.u32 %v3655_v38, %v2760_v37  ;;  %v2688_v45 = vld [vmem:[%s5559_s9 + $0x30] sm:$0xf]  ;;  %v3624_v37 = vld [vmem:[%s5560_s8 + $0x54] sm:$0xf]  ;;  %v2834_v38 = vld [vmem:[%s5560_s8 + $0x58] sm:$0xf0] }
 0x1ea   :  { %v287_v47 = vsel %vm228_vm0, %v282_v46, -inf }
 0x1eb   :  { %288 = vmax.xlane.f32.xlu0 %v287_v47  ;;  %v2725_v47 = vor.u32 %v3644_v39, %v2722_v41  ;;  %v2837_v39 = vor.u32 %v3624_v37, %v2834_v38  ;;  %v2698_v41 = vld [vmem:[%s5559_s9 + $0x48] sm:$0xf0] }
 0x1ed   :  { %755 = vmatpush.bf16.msra.mxu0 %v2725_v47 }
 0x1f1   :  { %756 = vmatpush.bf16.msra.mxu0 %v2717_v19  ;;  %v2800_v19 = vld [vmem:[%s5560_s8 + $0x10] sm:$0xf] }
 0x256   :  { %v286_v48 = vpop.xlane.xlu0 %285 }
 0x257   :  { %v290_v49 = vsub.f32 %v280_v42, %v286_v48  ;;  %v3660_v42 = vld [vmem:[%s5559_s9 + $0xf4] sm:$0xf] }
 0x258   :  { %v2789_v48 = vor.u32 %v3660_v42, %v2786_v43  ;;  %v3654_v42 = vld [vmem:[%s5559_s9 + $0xc4] sm:$0xf]  ;;  %v2701_v43 = vor.u32 %v3638_v40, %v2698_v41  ;;  %v2912_v41 = vld [vmem:[%s5561_s10 + $0x70] sm:$0xf] }
 0x259   :  { %v292_v50 = vmul.f32 1.442695, %v290_v49  ;;  %v2752_v49 = vld [vmem:[%s5559_s9 + $0xb0] sm:$0xf] }
 0x25a   :  { %769 = vmatpush.bf16.msra.mxu1 %v2789_v48 }
 0x25b   :  { %3845 = vpow2.f32 %v292_v50  ;;  %v3653_v50 = vld [vmem:[%s5559_s9 + $0xb4] sm:$0xf0] }
 0x25e   :  { %v289_v51 = vpop.xlane.xlu0 %288  ;;  %770 = vmatpush.bf16.msra.mxu1 %v2781_v23  ;;  %v2802_v23 = vld [vmem:[%s5560_s8 + $0x18] sm:$0xf0] }
 0x25f   :  { %v291_v52 = vsub.f32 %v282_v46, %v289_v51  ;;  %v3637_v46 = vld [vmem:[%s5559_s9 + $0x34] sm:$0xf0] }
 0x260   :  { %v2689_v51 = vor.u32 %v3637_v46, %v2688_v45  ;;  %v2824_v45 = vld [vmem:[%s5560_s8 + $0x40] sm:$0xf]  ;;  %v3623_v46 = vld [vmem:[%s5560_s8 + $0x44] sm:$0xf0] }
 0x261   :  { %v3846_v53 = vpop.eup %3845  ;;  %v294_v54 = vmul.f32 1.442695, %v291_v52  ;;  %v2753_v52 = vor.u32 %v3653_v50, %v2752_v49  ;;  %v2825_v48 = vor.u32 %v3623_v46, %v2824_v45  ;;  %v3622_v49 = vld [vmem:[%s5560_s8 + $0x44] sm:$0xf]  ;;  %v2826_v50 = vld [vmem:[%s5560_s8 + $0x48] sm:$0xf0] }
 0x262   :  { %v296_v55 = vsel %vm228_vm0, %v3846_v53, 0.0  ;;  %731 = vmatpush.bf16.msra.mxu2 %v2689_v51  ;;  %771 = vmatpush.bf16.msra.mxu1 %v2773_v35  ;;  %v2829_v51 = vor.u32 %v3622_v49, %v2826_v50  ;;  %v3676_v45 = vld [vmem:[%s5561_s10 + $0x74] sm:$0xf]  ;;  %v2914_v46 = vld [vmem:[%s5561_s10 + $0x78] sm:$0xf0] }
 0x263   :  { %3847 = vpow2.f32 %v294_v54  ;;  %297 = vadd.xlane.f32.xlu1 %v296_v55  ;;  %v3635_v54 = vld [vmem:[%s5559_s9 + $0x24] sm:$0xf0]  ;;  %v2744_v55 = vld [vmem:[%s5559_s9 + $0xa0] sm:$0xf] }
 0x269   :  { %v3848_v56 = vpop.eup %3847 }
 0x26a   :  { %v299_v57 = vsel %vm228_vm0, %v3848_v56, 0.0 }
 0x26b   :  { %300 = vadd.xlane.f32.xlu1 %v299_v57 }
 0x2d6   :  { %v298_v2 = vpop.xlane.xlu1 %297 }
 0x2d7   :  { %3849 = vrcp.f32 %v298_v2  ;;  %v2664_v2 = vld [vmem:[%s5559_s9] sm:$0xf] }
 0x2dd   :  { %v3850_v6 = vpop.eup %3849 }
 0x2de   :  { %v301_v5 = vpop.xlane.xlu1 %300  ;;  %v304_v8 = vmul.f32 %v3850_v6, %v3846_v53  ;;  %v2680_v53 = vld [vmem:[%s5559_s9 + $0x20] sm:$0xf]  ;;  %v2848_v6 = vld [vmem:[%s5560_s8 + $0x70] sm:$0xf] }
 0x2df   :  { %3851 = vrcp.f32 %v301_v5  ;;  %v2681_v57 = vor.u32 %v3635_v54, %v2680_v53  ;;  %v3647_v5 = vld [vmem:[%s5559_s9 + $0x84] sm:$0xf0]  ;;  %v2690_v53 = vld [vmem:[%s5559_s9 + $0x38] sm:$0xf0]  ;;  %v3652_v54 = vld [vmem:[%s5559_s9 + $0xb4] sm:$0xf] }
 0x2e0   :  { %v2729_v12 = vor.u32 %v3647_v5, %v2728_v4  ;;  %v2746_v4 = vld [vmem:[%s5559_s9 + $0xa8] sm:$0xf0] }
 0x2e1   :  { %732 = vmatpush.bf16.msra.mxu2 %v2681_v57  ;;  %v2816_v57 = vld [vmem:[%s5560_s8 + $0x30] sm:$0xf] }
 0x2e5   :  { %v3852_v7 = vpop.eup %3851  ;;  %733 = vmatpush.bf16.msra.mxu2 %v2673_v0  ;;  %v3634_v0 = vld [vmem:[%s5559_s9 + $0x24] sm:$0xf] }
 0x2e6   :  { %v305_v9 = vmul.f32 %v3852_v7, %v3848_v56  ;;  %v3651_v56 = vld [vmem:[%s5559_s9 + $0xa4] sm:$0xf0]  ;;  %v3629_v7 = vld [vmem:[%s5560_s8 + $0x74] sm:$0xf0] }
 0x2e7   :  { %v2745_v58 = vor.u32 %v3651_v56, %v2744_v55  ;;  %v2849_v13 = vor.u32 %v3629_v7, %v2848_v6  ;;  %v2754_v56 = vld [vmem:[%s5559_s9 + $0xb8] sm:$0xf0]  ;;  %v2808_v7 = vld [vmem:[%s5560_s8 + $0x20] sm:$0xf] }
 0x2e8   :  { %v306_v10 = vpack.c.bf16 %v305_v9, %v304_v8  ;;  %v2665_v8 = vor.u32 %v3631_v3, %v2664_v2  ;;  %v3628_v9 = vld [vmem:[%s5560_s8 + $0x74] sm:$0xf]  ;;  %v2757_v59 = vor.u32 %v3652_v54, %v2754_v56  ;;  %v2682_v2 = vld [vmem:[%s5559_s9 + $0x28] sm:$0xf0]  ;;  %v3650_v3 = vld [vmem:[%s5559_s9 + $0xa4] sm:$0xf] }
 0x2e9   :  { %v2685_v5 = vor.u32 %v3634_v0, %v2682_v2  ;;  %v2749_v6 = vor.u32 %v3650_v3, %v2746_v4  ;;  %v3675_v56 = vld [vmem:[%s5561_s10 + $0x64] sm:$0xf0]  ;;  %v3690_v0 = vld [vmem:[%s5561_s10 + $0xe4] sm:$0xf]  ;;  %v2896_v4 = vld [vmem:[%s5561_s10 + $0x50] sm:$0xf] }
 0x2ea   :  { %2597 = vmatmul.msk.bf16.vlgmr.msrb.gmra.mxu3 %vm228_vm0, %v306_v10  ;;  %v2850_v10 = vld [vmem:[%s5560_s8 + $0x78] sm:$0xf0]  ;;  %734 = vmatpush.bf16.msra.mxu2 %v2665_v8  ;;  %v3619_v8 = vld [vmem:[%s5560_s8 + $0x24] sm:$0xf0] }
 0x2eb   :  { %741 = vmatpush.bf16.msrb.mxu3 %v2785_v24  ;;  %v2853_v15 = vor.u32 %v3628_v9, %v2850_v10  ;;  %v2841_v24 = vor.u32 %v3627_v22, %v2840_v21  ;;  %v3618_v9 = vld [vmem:[%s5560_s8 + $0x24] sm:$0xf]  ;;  %v2809_v10 = vor.u32 %v3619_v8, %v2808_v7  ;;  %v3617_v21 = vld [vmem:[%s5560_s8 + $0x14] sm:$0xf0]  ;;  %v3616_v22 = vld [vmem:[%s5560_s8 + $0x14] sm:$0xf] }
 0x2ec   :  { %v2801_v25 = vor.u32 %v3617_v21, %v2800_v19  ;;  %v2960_v8 = vld [vmem:[%s5561_s10 + $0xd0] sm:$0xf]  ;;  %v3671_v19 = vld [vmem:[%s5561_s10 + $0x44] sm:$0xf0] }
 0x2ef   :  { %742 = vmatpush.bf16.msrb.mxu3 %v2777_v28  ;;  %v3640_v28 = vld [vmem:[%s5559_s9 + $0x54] sm:$0xf] }
 0x2f0   :  { %v2709_v31 = vor.u32 %v3640_v28, %v2706_v29  ;;  %v3646_v28 = vld [vmem:[%s5559_s9 + $0x84] sm:$0xf]  ;;  %v2805_v29 = vor.u32 %v3616_v22, %v2802_v23  ;;  %v2952_v22 = vld [vmem:[%s5561_s10 + $0xc0] sm:$0xf]  ;;  %v3687_v23 = vld [vmem:[%s5561_s10 + $0xc4] sm:$0xf0] }
 0x2f2   :  { %757 = vmatpush.bf16.msra.mxu0 %v2709_v31  ;;  %v2792_v31 = vld [vmem:[%s5560_s8] sm:$0xf] }
 0x2f3   :  { %743 = vmatpush.bf16.msrb.mxu3 %v2769_v34  ;;  %v3625_v34 = vld [vmem:[%s5560_s8 + $0x54] sm:$0xf0]  ;;  %v2793_v37 = vor.u32 %v3615_v32, %v2792_v31  ;;  %v2880_v32 = vld [vmem:[%s5561_s10 + $0x30] sm:$0xf] }
 0x2f4   :  { %v2833_v36 = vor.u32 %v3625_v34, %v2832_v33  ;;  %v3614_v33 = vld [vmem:[%s5560_s8 + $0x4] sm:$0xf]  ;;  %v2794_v34 = vld [vmem:[%s5560_s8 + $0x8] sm:$0xf0] }
 0x2f5   :  { %v2797_v38 = vor.u32 %v3614_v33, %v2794_v34  ;;  %v3669_v33 = vld [vmem:[%s5561_s10 + $0x34] sm:$0xf0]  ;;  %v2944_v34 = vld [vmem:[%s5561_s10 + $0xb0] sm:$0xf] }
 0x2f6   :  { %758 = vmatpush.bf16.msra.mxu0 %v2701_v43  ;;  %v2976_v43 = vld [vmem:[%s5561_s10 + $0xf0] sm:$0xf] }
 0x2f7   :  { %744 = vmatpush.bf16.msrb.mxu3 %v2761_v44  ;;  %v2762_v44 = vld [vmem:[%s5559_s9 + $0xc8] sm:$0xf0] }
 0x2f8   :  { %v2765_v47 = vor.u32 %v3654_v42, %v2762_v44  ;;  %v3677_v42 = vld [vmem:[%s5561_s10 + $0x74] sm:$0xf0] }
 0x2f9   :  { %v3693_v44 = vld [vmem:[%s5561_s10 + $0xf4] sm:$0xf0] }
 0x2fa   :  { %772 = vmatpush.bf16.msra.mxu1 %v2765_v47  ;;  %v3692_v47 = vld [vmem:[%s5561_s10 + $0xf4] sm:$0xf]  ;;  %v2977_v54 = vor.u32 %v3693_v44, %v2976_v43  ;;  %v2872_v43 = vld [vmem:[%s5561_s10 + $0x20] sm:$0xf]  ;;  %v3667_v44 = vld [vmem:[%s5561_s10 + $0x24] sm:$0xf0] }
 0x2fb   :  { %745 = vmatpush.bf16.msrb.mxu3 %v2753_v52  ;;  %v3636_v52 = vld [vmem:[%s5559_s9 + $0x34] sm:$0xf] }
 0x2fc   :  { %v2693_v55 = vor.u32 %v3636_v52, %v2690_v53  ;;  %v2913_v53 = vor.u32 %v3677_v42, %v2912_v41  ;;  %v2946_v41 = vld [vmem:[%s5561_s10 + $0xb8] sm:$0xf0] }
 0x2fe   :  { %759 = vmatpush.bf16.msra.mxu0 %v2693_v55  ;;  %773 = vmatpush.bf16.msra.mxu1 %v2757_v59  ;;  %v2904_v55 = vld [vmem:[%s5561_s10 + $0x60] sm:$0xf] }
 0x2ff   :  { %746 = vmatpush.bf16.msrb.mxu3 %v2745_v58  ;;  %v3621_v58 = vld [vmem:[%s5560_s8 + $0x34] sm:$0xf0]  ;;  %v2968_v59 = vld [vmem:[%s5561_s10 + $0xe0] sm:$0xf]  ;;  %v2905_v2 = vor.u32 %v3675_v56, %v2904_v55  ;;  %v2864_v55 = vld [vmem:[%s5561_s10 + $0x10] sm:$0xf] }
 0x300   :  { %v2817_v60 = vor.u32 %v3621_v58, %v2816_v57  ;;  %v2917_v57 = vor.u32 %v3676_v45, %v2914_v46  ;;  %v2936_v45 = vld [vmem:[%s5561_s10 + $0xa0] sm:$0xf]  ;;  %v2873_v46 = vor.u32 %v3667_v44, %v2872_v43  ;;  %v3665_v56 = vld [vmem:[%s5561_s10 + $0x14] sm:$0xf0] }
 0x302   :  { %760 = vmatpush.bf16.msra.mxu0 %v2685_v5  ;;  %774 = vmatpush.bf16.msra.mxu1 %v2749_v6  ;;  %v3673_v5 = vld [vmem:[%s5561_s10 + $0x54] sm:$0xf0] }
 0x303   :  { %747 = vmatpush.bf16.msrb.mxu3 %v2737_v1  ;;  %v2821_v1 = vor.u32 %v3620_v62, %v2818_v63  ;;  %v3674_v62 = vld [vmem:[%s5561_s10 + $0x64] sm:$0xf]  ;;  %v2906_v63 = vld [vmem:[%s5561_s10 + $0x68] sm:$0xf0] }
 0x304   :  { %v2909_v6 = vor.u32 %v3674_v62, %v2906_v63  ;;  %v2866_v62 = vld [vmem:[%s5561_s10 + $0x18] sm:$0xf0] }
 0x307   :  { %748 = vmatpush.bf16.msrb.mxu3 %v2729_v12  ;;  %v2810_v12 = vld [vmem:[%s5560_s8 + $0x28] sm:$0xf0] }
 0x308   :  { %v2813_v16 = vor.u32 %v3618_v9, %v2810_v12  ;;  %v3689_v9 = vld [vmem:[%s5561_s10 + $0xd4] sm:$0xf0]  ;;  %v2898_v12 = vld [vmem:[%s5561_s10 + $0x58] sm:$0xf0] }
 0x36d   :  { %v4169_v61 = vpop.f32.mrf.mxu3 }
 0x375   :  { %v4201_v11 = vpop.f32.mrf.mxu3 }
 0x376   :  { %v4205_v14 = vpack.c.bf16 %v4201_v11, %v4169_v61 }
 0x378   :  { %413 = vmatmul.bf16.vlgmr.msrb.gmra.mxu2 %v4205_v14  ;;  %475 = vmatmul.bf16.vlgmr.msra.gmra.mxu3 %v4205_v14 }
 0x379   :  { %863 = vmatpush.bf16.msrb.mxu2 %v2849_v13  ;;  %877 = vmatpush.bf16.msra.mxu3 %v2853_v15  ;;  %v3632_v13 = vld [vmem:[%s5559_s9 + $0x14] sm:$0xf]  ;;  %v2674_v15 = vld [vmem:[%s5559_s9 + $0x18] sm:$0xf0] }
 0x37a   :  { %v2677_v20 = vor.u32 %v3632_v13, %v2674_v15  ;;  %v3688_v13 = vld [vmem:[%s5561_s10 + $0xd4] sm:$0xf]  ;;  %v2962_v15 = vld [vmem:[%s5561_s10 + $0xd8] sm:$0xf0] }
 0x37b   :  { %v2965_v21 = vor.u32 %v3688_v13, %v2962_v15  ;;  %v3678_v15 = vld [vmem:[%s5561_s10 + $0x84] sm:$0xf] }
 0x37c   :  { %761 = vmatpush.bf16.msra.mxu0 %v2677_v20 }
 0x37d   :  { %864 = vmatpush.bf16.msrb.mxu2 %v2841_v24  ;;  %878 = vmatpush.bf16.msra.mxu3 %v2845_v27  ;;  %v2741_v24 = vor.u32 %v3648_v17, %v2738_v18  ;;  %v2666_v27 = vld [vmem:[%s5559_s9 + $0x8] sm:$0xf0]  ;;  %v2961_v17 = vor.u32 %v3689_v9, %v2960_v8  ;;  %v2888_v18 = vld [vmem:[%s5561_s10 + $0x40] sm:$0xf]  ;;  %v3679_v8 = vld [vmem:[%s5561_s10 + $0x84] sm:$0xf0] }
 0x37e   :  { %v2669_v35 = vor.u32 %v3630_v26, %v2666_v27  ;;  %v3686_v26 = vld [vmem:[%s5561_s10 + $0xc4] sm:$0xf]  ;;  %v2954_v27 = vld [vmem:[%s5561_s10 + $0xc8] sm:$0xf0] }
 0x37f   :  { %775 = vmatpush.bf16.msra.mxu1 %v2741_v24  ;;  %v3670_v24 = vld [vmem:[%s5561_s10 + $0x44] sm:$0xf]  ;;  %v2957_v31 = vor.u32 %v3686_v26, %v2954_v27 }
 0x380   :  { %762 = vmatpush.bf16.msra.mxu0 %v2669_v35  ;;  %v2881_v35 = vor.u32 %v3669_v33, %v2880_v32  ;;  %v3662_v9 = vld [vmem:[%s5561_s10 + $0x4] sm:$0xf] }
 0x381   :  { %865 = vmatpush.bf16.msrb.mxu2 %v2833_v36  ;;  %879 = vmatpush.bf16.msra.mxu3 %v2837_v39  ;;  %v2733_v36 = vor.u32 %v3646_v28, %v2730_v30  ;;  %v2889_v28 = vor.u32 %v3671_v19, %v2888_v18 }
 0x383   :  { %776 = vmatpush.bf16.msra.mxu1 %v2733_v36  ;;  %v3685_v36 = vld [vmem:[%s5561_s10 + $0xb4] sm:$0xf0] }
 0x385   :  { %866 = vmatpush.bf16.msrb.mxu2 %v2825_v48  ;;  %880 = vmatpush.bf16.msra.mxu3 %v2829_v51  ;;  %v2978_v48 = vld [vmem:[%s5561_s10 + $0xf8] sm:$0xf0] }
 0x386   :  { %v2981_v58 = vor.u32 %v3692_v47, %v2978_v48  ;;  %v3683_v47 = vld [vmem:[%s5561_s10 + $0xa4] sm:$0xf0]  ;;  %v3666_v48 = vld [vmem:[%s5561_s10 + $0x24] sm:$0xf] }
 0x389   :  { %867 = vmatpush.bf16.msrb.mxu2 %v2817_v60  ;;  %881 = vmatpush.bf16.msra.mxu3 %v2821_v1  ;;  %v3691_v60 = vld [vmem:[%s5561_s10 + $0xe4] sm:$0xf0]  ;;  %v2970_v1 = vld [vmem:[%s5561_s10 + $0xe8] sm:$0xf0] }
 0x38a   :  { %v2969_v3 = vor.u32 %v3691_v60, %v2968_v59  ;;  %v2973_v7 = vor.u32 %v3690_v0, %v2970_v1  ;;  %v3681_v59 = vld [vmem:[%s5561_s10 + $0x94] sm:$0xf0]  ;;  %v3664_v60 = vld [vmem:[%s5561_s10 + $0x14] sm:$0xf] }
 0x38b   :  { %v2869_v0 = vor.u32 %v3664_v60, %v2866_v62  ;;  %v3680_v1 = vld [vmem:[%s5561_s10 + $0x94] sm:$0xf] }
 0x38d   :  { %868 = vmatpush.bf16.msrb.mxu2 %v2809_v10  ;;  %882 = vmatpush.bf16.msra.mxu3 %v2813_v16  ;;  %v3672_v10 = vld [vmem:[%s5561_s10 + $0x54] sm:$0xf]  ;;  %v2897_v16 = vor.u32 %v3673_v5, %v2896_v4  ;;  %v2856_v4 = vld [vmem:[%s5561_s10] sm:$0xf]  ;;  %v3663_v5 = vld [vmem:[%s5561_s10 + $0x4] sm:$0xf0] }
 0x38e   :  { %v2901_v20 = vor.u32 %v3672_v10, %v2898_v12  ;;  %v2858_v10 = vld [vmem:[%s5561_s10 + $0x8] sm:$0xf0] }
 0x38f   :  { %v2861_v13 = vor.u32 %v3662_v9, %v2858_v10  ;;  %v3062_v9 = vld [vmem:[%s5563_s12 + $0x70] sm:$0xf]  ;;  %v3808_v10 = vld [vmem:[%s5563_s12 + $0x74] sm:$0xf0] }
 0x391   :  { %869 = vmatpush.bf16.msrb.mxu2 %v2801_v25  ;;  %883 = vmatpush.bf16.msra.mxu3 %v2805_v29  ;;  %v2890_v25 = vld [vmem:[%s5561_s10 + $0x48] sm:$0xf0]  ;;  %v2953_v29 = vor.u32 %v3687_v23, %v2952_v22 }
 0x392   :  { %v2893_v30 = vor.u32 %v3670_v24, %v2890_v25 }
 0x395   :  { %870 = vmatpush.bf16.msrb.mxu2 %v2793_v37  ;;  %884 = vmatpush.bf16.msra.mxu3 %v2797_v38  ;;  %v2882_v37 = vld [vmem:[%s5561_s10 + $0x38] sm:$0xf0]  ;;  %v2945_v38 = vor.u32 %v3685_v36, %v2944_v34 }
 0x3fb   :  { %v414_v39 = vpop.f32.mrf.mxu2  ;;  %v476_v40 = vpop.f32.mrf.mxu3 }
 0x403   :  { %v416_v49 = vpop.f32.mrf.mxu2  ;;  %v478_v50 = vpop.f32.mrf.mxu3 }
 0x404   :  { %v481_v51 = vpack.c.bf16 %v416_v49, %v414_v39  ;;  %v500_v52 = vpack.c.bf16 %v478_v50, %v476_v40  ;;  %v3684_v40 = vld [vmem:[%s5561_s10 + $0xb4] sm:$0xf]  ;;  %v2874_v49 = vld [vmem:[%s5561_s10 + $0x28] sm:$0xf0]  ;;  %v2937_v50 = vor.u32 %v3683_v47, %v2936_v45 }
 0x405   :  { %v2949_v42 = vor.u32 %v3684_v40, %v2946_v41 }
 0x406   :  { %490 = vmatmul.bf16.vlgmr.msrb.gmra.mxu0 %v481_v51  ;;  %509 = vmatmul.bf16.vlgmr.msrb.gmra.mxu1 %v500_v52 }
 0x407   :  { %735 = vmatmul.bf16.vlgmr.msra.gmra.mxu2 %v481_v51  ;;  %749 = vmatmul.bf16.vlgmr.msrb.gmra.mxu3 %v500_v52 }
 0x408   :  { %1085 = vmatpush.bf16.msrb.mxu0 %v2913_v53  ;;  %1099 = vmatpush.bf16.msrb.mxu1 %v2977_v54  ;;  %v2938_v53 = vld [vmem:[%s5561_s10 + $0xa8] sm:$0xf0] }
 0x409   :  { %1113 = vmatpush.bf16.msra.mxu2 %v2917_v57  ;;  %1127 = vmatpush.bf16.msrb.mxu3 %v2981_v58  ;;  %v2928_v57 = vld [vmem:[%s5561_s10 + $0x90] sm:$0xf]  ;;  %v2865_v58 = vor.u32 %v3665_v56, %v2864_v55 }
 0x40a   :  { %v2929_v63 = vor.u32 %v3681_v59, %v2928_v57 }
 0x40c   :  { %1086 = vmatpush.bf16.msrb.mxu0 %v2905_v2  ;;  %1100 = vmatpush.bf16.msrb.mxu1 %v2969_v3  ;;  %v2930_v2 = vld [vmem:[%s5561_s10 + $0x98] sm:$0xf0] }
 0x40d   :  { %1114 = vmatpush.bf16.msra.mxu2 %v2909_v6  ;;  %1128 = vmatpush.bf16.msrb.mxu3 %v2973_v7  ;;  %v2933_v3 = vor.u32 %v3680_v1, %v2930_v2  ;;  %v2920_v6 = vld [vmem:[%s5561_s10 + $0x80] sm:$0xf]  ;;  %v2857_v7 = vor.u32 %v3663_v5, %v2856_v4  ;;  %v3695_v5 = vld [vmem:[%s5562_s14 + $0x8] sm:$0xff] }
 0x40e   :  { %v2921_v12 = vor.u32 %v3679_v8, %v2920_v6  ;;  %v3694_v4 = vld [vmem:[%s5562_s14] sm:$0xff] }
 0x410   :  { %1087 = vmatpush.bf16.msrb.mxu0 %v2897_v16  ;;  %1101 = vmatpush.bf16.msrb.mxu1 %v2961_v17  ;;  %v2922_v16 = vld [vmem:[%s5561_s10 + $0x88] sm:$0xf0] }
 0x411   :  { %1115 = vmatpush.bf16.msra.mxu2 %v2901_v20  ;;  %1129 = vmatpush.bf16.msrb.mxu3 %v2965_v21  ;;  %v2925_v17 = vor.u32 %v3678_v15, %v2922_v16  ;;  %v3064_v15 = vld [vmem:[%s5563_s12 + $0x78] sm:$0xf0]  ;;  %v3054_v16 = vld [vmem:[%s5563_s12 + $0x60] sm:$0xf] }
 0x414   :  { %1088 = vmatpush.bf16.msrb.mxu0 %v2889_v28  ;;  %1102 = vmatpush.bf16.msrb.mxu1 %v2953_v29 }
 0x415   :  { %1116 = vmatpush.bf16.msra.mxu2 %v2893_v30  ;;  %1130 = vmatpush.bf16.msrb.mxu3 %v2957_v31 }
 0x416   :  { %763 = vmatmul.bf16.vlgmr.msra.gmra.mxu0 %v481_v51  ;;  %777 = vmatmul.bf16.vlgmr.msra.gmra.mxu1 %v500_v52  ;;  %v2877_v51 = vor.u32 %v3666_v48, %v2874_v49  ;;  %v3682_v52 = vld [vmem:[%s5561_s10 + $0xa4] sm:$0xf] }
 0x417   :  { %871 = vmatmul.bf16.vlgmr.msrb.gmra.mxu2 %v4205_v14  ;;  %885 = vmatmul.bf16.vlgmr.msra.gmra.mxu3 %v4205_v14  ;;  %v3668_v14 = vld [vmem:[%s5561_s10 + $0x34] sm:$0xf]  ;;  %v2941_v54 = vor.u32 %v3682_v52, %v2938_v53 }
 0x418   :  { %v2885_v39 = vor.u32 %v3668_v14, %v2882_v37  ;;  %1089 = vmatpush.bf16.msrb.mxu0 %v2881_v35  ;;  %1103 = vmatpush.bf16.msrb.mxu1 %v2945_v38 }
 0x419   :  { %1131 = vmatpush.bf16.msrb.mxu3 %v2949_v42 }
 0x41a   :  { %1117 = vmatpush.bf16.msra.mxu2 %v2885_v39 }
 0x41c   :  { %1090 = vmatpush.bf16.msrb.mxu0 %v2873_v46  ;;  %1104 = vmatpush.bf16.msrb.mxu1 %v2937_v50 }
 0x41d   :  { %1132 = vmatpush.bf16.msrb.mxu3 %v2941_v54 }
 0x41e   :  { %1118 = vmatpush.bf16.msra.mxu2 %v2877_v51 }
 0x420   :  { %1091 = vmatpush.bf16.msrb.mxu0 %v2865_v58  ;;  %1105 = vmatpush.bf16.msrb.mxu1 %v2929_v63 }
 0x421   :  { %1133 = vmatpush.bf16.msrb.mxu3 %v2933_v3 }
 0x422   :  { %1119 = vmatpush.bf16.msra.mxu2 %v2869_v0 }
 0x424   :  { %1092 = vmatpush.bf16.msrb.mxu0 %v2857_v7  ;;  %1106 = vmatpush.bf16.msrb.mxu1 %v2921_v12  ;;  %v3063_v12 = vor.u32 %v3808_v10, %v3062_v9  ;;  %v3794_v9 = vld [vmem:[%s5563_s12 + $0x4] sm:$0xf0]  ;;  %v3166_v10 = vld [vmem:[%s5581_s7 + $0xc0] sm:$0xf] }
 0x425   :  { %1134 = vmatpush.bf16.msrb.mxu3 %v2925_v17 }
 0x426   :  { %1120 = vmatpush.bf16.msra.mxu2 %v2861_v13  ;;  %v3807_v13 = vld [vmem:[%s5563_s12 + $0x74] sm:$0xf] }
 0x42a   :  { %1465 = vmatpush.bf16.msrb.mxu2 %v3063_v12  ;;  %v3722_v12 = vld [vmem:[%s5581_s7 + $0xc4] sm:$0xf0] }
 0x483   :  { %v491_v18 = vpop.f32.mrf.mxu0  ;;  %v510_v19 = vpop.f32.mrf.mxu1 }
 0x484   :  { %v496_v20 = vmul.f32 2.0, %v491_v18  ;;  %v515_v21 = vmul.f32 2.0, %v510_v19  ;;  %v3067_v18 = vor.u32 %v3807_v13, %v3064_v15  ;;  %v3806_v19 = vld [vmem:[%s5563_s12 + $0x64] sm:$0xf0]  ;;  %v3254_v13 = vld [vmem:[%s5581_s7 + $0x170] sm:$0xf] }
 0x485   :  { %v3744_v15 = vld [vmem:[%s5581_s7 + $0x174] sm:$0xf0] }
 0x486   :  { %v498_v26 = vsub.f32 %v496_v20, %v4169_v61  ;;  %v517_v27 = vsub.f32 %v515_v21, %v4169_v61  ;;  %v3055_v20 = vor.u32 %v3806_v19, %v3054_v16  ;;  %v3805_v21 = vld [vmem:[%s5563_s12 + $0x64] sm:$0xf] }
 0x488   :  { %1466 = vmatpush.bf16.msrb.mxu2 %v3055_v20 }
 0x48a   :  { %v736_v32 = vpop.f32.mrf.mxu2  ;;  %v750_v33 = vpop.f32.mrf.mxu3 }
 0x48b   :  { %v493_v22 = vpop.f32.mrf.mxu0  ;;  %v512_v23 = vpop.f32.mrf.mxu1  ;;  %v751_v43 = vadd.f32 %v750_v33, %v736_v32  ;;  %v3801_v33 = vld [vmem:[%s5563_s12 + $0x44] sm:$0xf] }
 0x48c   :  { %v497_v24 = vmul.f32 2.0, %v493_v22  ;;  %v516_v25 = vmul.f32 2.0, %v512_v23  ;;  %v3056_v22 = vld [vmem:[%s5563_s12 + $0x68] sm:$0xf0]  ;;  %v3046_v23 = vld [vmem:[%s5563_s12 + $0x50] sm:$0xf] }
 0x48e   :  { %v499_v28 = vsub.f32 %v497_v24, %v4201_v11  ;;  %v518_v29 = vsub.f32 %v516_v25, %v4201_v11  ;;  %v3804_v24 = vld [vmem:[%s5563_s12 + $0x54] sm:$0xf0]  ;;  %v3059_v25 = vor.u32 %v3805_v21, %v3056_v22  ;;  %v3318_v21 = vld [vmem:[%s5581_s7 + $0x1f0] sm:$0xf]  ;;  %v3167_v22 = vor.u32 %v3722_v12, %v3166_v10 }
 0x48f   :  { %v3286_v12 = vld [vmem:[%s5581_s7 + $0x1b0] sm:$0xf] }
 0x490   :  { %v923_v30 = vpack.c.bf16 %v499_v28, %v498_v26  ;;  %v924_v31 = vpack.c.bf16 %v518_v29, %v517_v27  ;;  %v3047_v26 = vor.u32 %v3804_v24, %v3046_v23  ;;  %v3803_v27 = vld [vmem:[%s5563_s12 + $0x54] sm:$0xf]  ;;  %v3048_v28 = vld [vmem:[%s5563_s12 + $0x58] sm:$0xf0]  ;;  %v3038_v29 = vld [vmem:[%s5563_s12 + $0x40] sm:$0xf] }
 0x491   :  { %v3094_v23 = vld [vmem:[%s5581_s7 + $0x30] sm:$0xf]  ;;  %v3704_v24 = vld [vmem:[%s5581_s7 + $0x34] sm:$0xf0] }
 0x492   :  { %1093 = vmatmul.bf16.vlgmr.msrb.gmra.mxu0 %v923_v30  ;;  %1107 = vmatmul.bf16.vlgmr.msrb.gmra.mxu1 %v924_v31  ;;  %v738_v34 = vpop.f32.mrf.mxu2  ;;  %v752_v35 = vpop.f32.mrf.mxu3 }
 0x493   :  { %1121 = vmatmul.bf16.vlgmr.msra.gmra.mxu2 %v923_v30  ;;  %1135 = vmatmul.bf16.vlgmr.msrb.gmra.mxu3 %v924_v31  ;;  %v764_v36 = vpop.f32.mrf.mxu0  ;;  %v778_v14 = vpop.f32.mrf.mxu1  ;;  %v753_v45 = vadd.f32 %v752_v35, %v738_v34  ;;  %v3802_v30 = vld [vmem:[%s5563_s12 + $0x44] sm:$0xf0]  ;;  %v3051_v31 = vor.u32 %v3803_v27, %v3048_v28  ;;  %v3040_v34 = vld [vmem:[%s5563_s12 + $0x48] sm:$0xf0]  ;;  %v4635_v35 = vld [vmem:[%s5562_s14 + $0x10] sm:$0xff] }
 0x494   :  { %v779_v55 = vadd.f32 %v778_v14, %v764_v36  ;;  %1467 = vmatpush.bf16.msrb.mxu2 %v3047_v26  ;;  %v3039_v32 = vor.u32 %v3802_v30, %v3038_v29  ;;  %v3030_v36 = vld [vmem:[%s5563_s12 + $0x30] sm:$0xf]  ;;  %v3800_v14 = vld [vmem:[%s5563_s12 + $0x34] sm:$0xf0]  ;;  %v3246_v29 = vld [vmem:[%s5581_s7 + $0x160] sm:$0xf] }
 0x495   :  { %v3760_v26 = vld [vmem:[%s5581_s7 + $0x1f4] sm:$0xf0]  ;;  %v3158_v27 = vld [vmem:[%s5581_s7 + $0xb0] sm:$0xf]  ;;  %v3742_v30 = vld [vmem:[%s5581_s7 + $0x164] sm:$0xf0] }
 0x496   :  { %v3720_v28 = vld [vmem:[%s5581_s7 + $0xb4] sm:$0xf0] }
 0x498   :  { %1468 = vmatpush.bf16.msrb.mxu2 %v3039_v32  ;;  %v3095_v32 = vor.u32 %v3704_v24, %v3094_v23  ;;  %v3206_v23 = vld [vmem:[%s5581_s7 + $0x110] sm:$0xf]  ;;  %v3732_v24 = vld [vmem:[%s5581_s7 + $0x114] sm:$0xf0] }
 0x49a   :  { %v872_v37 = vpop.f32.mrf.mxu2  ;;  %v886_v38 = vpop.f32.mrf.mxu3 }
 0x49b   :  { %v766_v39 = vpop.f32.mrf.mxu0  ;;  %v780_v61 = vpop.f32.mrf.mxu1  ;;  %v873_v46 = vadd.f32 %v872_v37, %v751_v43  ;;  %v887_v59 = vadd.f32 %v886_v38, %v779_v55  ;;  %v3043_v37 = vor.u32 %v3801_v33, %v3040_v34  ;;  %v3799_v38 = vld [vmem:[%s5563_s12 + $0x34] sm:$0xf]  ;;  %v3798_v43 = vld [vmem:[%s5563_s12 + $0x24] sm:$0xf0]  ;;  %v3014_v55 = vld [vmem:[%s5563_s12 + $0x10] sm:$0xf]  ;;  %v3319_v33 = vor.u32 %v3760_v26, %v3318_v21 }
 0x49c   :  { %v781_v60 = vadd.f32 %v780_v61, %v766_v39  ;;  %v3032_v39 = vld [vmem:[%s5563_s12 + $0x38] sm:$0xf0]  ;;  %v3031_v61 = vor.u32 %v3800_v14, %v3030_v36  ;;  %v3310_v34 = vld [vmem:[%s5581_s7 + $0x1e0] sm:$0xf]  ;;  %v3758_v36 = vld [vmem:[%s5581_s7 + $0x1e4] sm:$0xf0]  ;;  %v3159_v14 = vor.u32 %v3720_v28, %v3158_v27  ;;  %v3207_v26 = vor.u32 %v3732_v24, %v3206_v23 }
 0x49d   :  { %v3278_v21 = vld [vmem:[%s5581_s7 + $0x1a0] sm:$0xf]  ;;  %v3270_v27 = vld [vmem:[%s5581_s7 + $0x190] sm:$0xf]  ;;  %v3748_v28 = vld [vmem:[%s5581_s7 + $0x194] sm:$0xf0] }
 0x49e   :  { %1469 = vmatpush.bf16.msrb.mxu2 %v3031_v61  ;;  %v3702_v61 = vld [vmem:[%s5581_s7 + $0x24] sm:$0xf0] }
 0x49f   :  { %v3786_v24 = vld [vmem:[%s5581_s7 + $0x2c4] sm:$0xf0] }
 0x4a2   :  { %v874_v40 = vpop.f32.mrf.mxu2  ;;  %v888_v41 = vpop.f32.mrf.mxu3 }
 0x4a3   :  { %v875_v51 = vadd.f32 %v874_v40, %v753_v45  ;;  %v889_v1 = vadd.f32 %v888_v41, %v781_v60  ;;  %v3126_v40 = vld [vmem:[%s5581_s7 + $0x70] sm:$0xf]  ;;  %v3712_v41 = vld [vmem:[%s5581_s7 + $0x74] sm:$0xf0] }
 0x4a4   :  { %v3728_v45 = vld [vmem:[%s5581_s7 + $0xf4] sm:$0xf0] }
 0x4a5   :  { %v3708_v60 = vld [vmem:[%s5581_s7 + $0x54] sm:$0xf0] }
 0x50f   :  { %v1094_v42 = vpop.f32.mrf.mxu0  ;;  %v1108_v11 = vpop.f32.mrf.mxu1 }
 0x510   :  { %v1109_v44 = vadd.f32 %v1108_v11, %v1094_v42  ;;  %v3190_v42 = vld [vmem:[%s5581_s7 + $0xf0] sm:$0xf]  ;;  %v3022_v11 = vld [vmem:[%s5563_s12 + $0x20] sm:$0xf] }
 0x512   :  { %v1141_v52 = vadd.f32 %v1109_v44, %v873_v46  ;;  %v3127_v44 = vor.u32 %v3712_v41, %v3126_v40  ;;  %v3191_v46 = vor.u32 %v3728_v45, %v3190_v42  ;;  %v3740_v40 = vld [vmem:[%s5581_s7 + $0x154] sm:$0xf0]  ;;  %v3718_v41 = vld [vmem:[%s5581_s7 + $0xa4] sm:$0xf0] }
 0x514   :  { %v1145_v57 = vmax.f32 %v1141_v52, 0.0  ;;  %v3023_v52 = vor.u32 %v3798_v43, %v3022_v11  ;;  %v3311_v11 = vor.u32 %v3758_v36, %v3310_v34  ;;  %v3302_v43 = vld [vmem:[%s5581_s7 + $0x1d0] sm:$0xf]  ;;  %v3262_v36 = vld [vmem:[%s5581_s7 + $0x180] sm:$0xf] }
 0x516   :  { %v1122_v47 = vpop.f32.mrf.mxu2  ;;  %v1136_v48 = vpop.f32.mrf.mxu3  ;;  %1470 = vmatpush.bf16.msrb.mxu2 %v3023_v52  ;;  %v3861_v52 = vld [vmem:[%s5580_s20] sm:$0xff] }
 0x517   :  { %v1096_v49 = vpop.f32.mrf.mxu0  ;;  %v1110_v50 = vpop.f32.mrf.mxu1  ;;  %v1137_v56 = vadd.f32 %v1136_v48, %v1122_v47  ;;  %v3118_v47 = vld [vmem:[%s5581_s7 + $0x60] sm:$0xf]  ;;  %v3035_v48 = vor.u32 %v3799_v38, %v3032_v39  ;;  %v3238_v38 = vld [vmem:[%s5581_s7 + $0x150] sm:$0xf] }
 0x518   :  { %v1111_v53 = vadd.f32 %v1110_v50, %v1096_v49  ;;  %v3710_v49 = vld [vmem:[%s5581_s7 + $0x64] sm:$0xf0]  ;;  %v3182_v50 = vld [vmem:[%s5581_s7 + $0xe0] sm:$0xf] }
 0x519   :  { %v1142_v2 = vadd.f32 %v1137_v56, %v887_v59  ;;  %v3119_v56 = vor.u32 %v3710_v49, %v3118_v47  ;;  %v3110_v59 = vld [vmem:[%s5581_s7 + $0x50] sm:$0xf]  ;;  %v3086_v39 = vld [vmem:[%s5581_s7 + $0x20] sm:$0xf] }
 0x51a   :  { %v1143_v54 = vadd.f32 %v1111_v53, %v875_v51  ;;  %v3726_v51 = vld [vmem:[%s5581_s7 + $0xe4] sm:$0xf0]  ;;  %v3797_v53 = vld [vmem:[%s5563_s12 + $0x24] sm:$0xf]  ;;  %v3087_v42 = vor.u32 %v3702_v61, %v3086_v39  ;;  %v3078_v47 = vld [vmem:[%s5581_s7 + $0x10] sm:$0xf] }
 0x51b   :  { %v1146_v7 = vmax.f32 %v1142_v2, 0.0  ;;  %v3016_v2 = vld [vmem:[%s5563_s12 + $0x18] sm:$0xf0]  ;;  %v3142_v49 = vld [vmem:[%s5581_s7 + $0x90] sm:$0xf] }
 0x51c   :  { %v1147_v58 = vmax.f32 %v1143_v54, 0.0  ;;  %v3024_v54 = vld [vmem:[%s5563_s12 + $0x28] sm:$0xf0]  ;;  %v3192_v39 = vld [vmem:[%s5581_s7 + $0xf8] sm:$0xf0] }
 0x51d   :  { %v3709_v61 = vld [vmem:[%s5581_s7 + $0x64] sm:$0xf] }
 0x51e   :  { %v1151_v62 = vpack.c.bf16 %v1147_v58, %v1145_v57  ;;  %v1124_v63 = vpop.f32.mrf.mxu2  ;;  %v1138_v0 = vpop.f32.mrf.mxu3  ;;  %v3183_v57 = vor.u32 %v3726_v51, %v3182_v50  ;;  %v3796_v58 = vld [vmem:[%s5563_s12 + $0x14] sm:$0xf0]  ;;  %v3230_v50 = vld [vmem:[%s5581_s7 + $0x140] sm:$0xf]  ;;  %v3738_v51 = vld [vmem:[%s5581_s7 + $0x144] sm:$0xf0] }
 0x51f   :  { %v1139_v3 = vadd.f32 %v1138_v0, %v1124_v63  ;;  %v3724_v63 = vld [vmem:[%s5581_s7 + $0xd4] sm:$0xf0]  ;;  %v3027_v0 = vor.u32 %v3797_v53, %v3024_v54  ;;  %v3294_v54 = vld [vmem:[%s5581_s7 + $0x1c0] sm:$0xf] }
 0x520   :  { %1168 = vmatpush.bf16.msra.mxu1 %v1151_v62  ;;  %1207 = vmatpush.bf16.msra.mxu3 %v1151_v62  ;;  %v3716_v53 = vld [vmem:[%s5581_s7 + $0x94] sm:$0xf0] }
 0x521   :  { %v1144_v6 = vadd.f32 %v1139_v3, %v889_v1  ;;  %v3795_v1 = vld [vmem:[%s5563_s12 + $0x14] sm:$0xf]  ;;  %v3111_v3 = vor.u32 %v3708_v60, %v3110_v59  ;;  %v3736_v59 = vld [vmem:[%s5581_s7 + $0x134] sm:$0xf0]  ;;  %v3143_v60 = vor.u32 %v3716_v53, %v3142_v49  ;;  %v3176_v49 = vld [vmem:[%s5581_s7 + $0xd8] sm:$0xf0] }
 0x522   :  { %v3019_v16 = vor.u32 %v3795_v1, %v3016_v2  ;;  %v3134_v1 = vld [vmem:[%s5581_s7 + $0x80] sm:$0xf]  ;;  %v3714_v2 = vld [vmem:[%s5581_s7 + $0x84] sm:$0xf0]  ;;  %v3721_v53 = vld [vmem:[%s5581_s7 + $0xc4] sm:$0xf] }
 0x523   :  { %v1148_v8 = vmax.f32 %v1144_v6, 0.0  ;;  %2986 = vmatmul.msk.bf16.vlgmr.msra.gmra.mxu1 %vm228_vm0, %v3694_v4  ;;  %2994 = vmatmul.msk.bf16.vlgmr.msra.gmra.mxu3 %vm228_vm0, %v3695_v5 }
 0x525   :  { %v1152_v17 = vpack.c.bf16 %v1148_v8, %v1146_v7  ;;  %v3102_v7 = vld [vmem:[%s5581_s7 + $0x40] sm:$0xf]  ;;  %v3706_v8 = vld [vmem:[%s5581_s7 + $0x44] sm:$0xf0] }
 0x526   :  { %v3103_v19 = vor.u32 %v3706_v8, %v3102_v7  ;;  %v3792_v7 = vld [vmem:[%s5581_s7 + $0x2f4] sm:$0xf0] }
 0x527   :  { %1182 = vmatpush.bf16.msrb.mxu1 %v1152_v17  ;;  %1221 = vmatpush.bf16.msra.mxu0 %v1152_v17 }
 0x528   :  { %1260 = vmatpush.bf16.msrb.mxu3 %v1152_v17  ;;  %v3793_v17 = vld [vmem:[%s5563_s12 + $0x4] sm:$0xf] }
 0x52a   :  { %2995 = vmatmul.msk.bf16.vlgmr.msra.gmra.mxu0 %vm228_vm0, %v3695_v5  ;;  %v3006_v5 = vld [vmem:[%s5563_s12] sm:$0xf] }
 0x52b   :  { %1246 = vmatpush.bf16.msra.mxu1 %v1151_v62  ;;  %1479 = vmatpush.bf16.msrb.mxu0 %v3067_v18  ;;  %v3174_v62 = vld [vmem:[%s5581_s7 + $0xd0] sm:$0xf]  ;;  %v3008_v18 = vld [vmem:[%s5563_s12 + $0x8] sm:$0xf0]  ;;  %v3007_v20 = vor.u32 %v3794_v9, %v3006_v5  ;;  %v3135_v9 = vor.u32 %v3714_v2, %v3134_v1  ;;  %v3096_v1 = vld [vmem:[%s5581_s7 + $0x38] sm:$0xf0] }
 0x52c   :  { %1987 = vmatpush.bf16.msra.mxu3 %v3191_v46  ;;  %v3175_v6 = vor.u32 %v3724_v63, %v3174_v62  ;;  %v3239_v46 = vor.u32 %v3740_v40, %v3238_v38  ;;  %v3231_v62 = vor.u32 %v3738_v51, %v3230_v50  ;;  %v3070_v63 = vld [vmem:[%s5581_s7] sm:$0xf]  ;;  %v3727_v38 = vld [vmem:[%s5581_s7 + $0xf4] sm:$0xf]  ;;  %v3120_v40 = vld [vmem:[%s5581_s7 + $0x68] sm:$0xf0] }
 0x52d   :  { %v3705_v51 = vld [vmem:[%s5581_s7 + $0x44] sm:$0xf]  ;;  %v3719_v2 = vld [vmem:[%s5581_s7 + $0xb4] sm:$0xf] }
 0x52f   :  { %1480 = vmatpush.bf16.msrb.mxu0 %v3059_v25  ;;  %v3255_v25 = vor.u32 %v3744_v15, %v3254_v13  ;;  %v3752_v13 = vld [vmem:[%s5581_s7 + $0x1b4] sm:$0xf0] }
 0x530   :  { %1988 = vmatpush.bf16.msra.mxu3 %v3183_v57  ;;  %v3754_v57 = vld [vmem:[%s5581_s7 + $0x1c4] sm:$0xf0] }
 0x531   :  { %v3295_v8 = vor.u32 %v3754_v57, %v3294_v54  ;;  %v3774_v57 = vld [vmem:[%s5581_s7 + $0x264] sm:$0xf0] }
 0x533   :  { %1481 = vmatpush.bf16.msrb.mxu0 %v3051_v31  ;;  %2987 = vmatmul.msk.bf16.vlgmr.msrb.gmra.mxu1 %vm228_vm0, %v3694_v4  ;;  %v3015_v4 = vor.u32 %v3796_v58, %v3014_v55  ;;  %v3011_v31 = vor.u32 %v3793_v17, %v3008_v18  ;;  %v3222_v58 = vld [vmem:[%s5581_s7 + $0x130] sm:$0xf]  ;;  %v3734_v17 = vld [vmem:[%s5581_s7 + $0x124] sm:$0xf0] }
 0x534   :  { %3003 = vmatmul.msk.bf16.vlgmr.msrb.gmra.mxu3 %vm228_vm0, %v4635_v35  ;;  %1973 = vmatpush.bf16.msrb.mxu1 %v3127_v44  ;;  %v3756_v44 = vld [vmem:[%s5581_s7 + $0x1d4] sm:$0xf0]  ;;  %v3223_v10 = vor.u32 %v3736_v59, %v3222_v58 }
 0x535   :  { %1471 = vmatpush.bf16.msrb.mxu2 %v3015_v4  ;;  %1989 = vmatpush.bf16.msra.mxu3 %v3175_v6  ;;  %v3776_v4 = vld [vmem:[%s5581_s7 + $0x274] sm:$0xf0]  ;;  %v3446_v6 = vld [vmem:[%s5581_s7 + $0x2f0] sm:$0xf] }
 0x536   :  { %v3447_v18 = vor.u32 %v3792_v7, %v3446_v6  ;;  %v3366_v6 = vld [vmem:[%s5581_s7 + $0x250] sm:$0xf]  ;;  %v3772_v7 = vld [vmem:[%s5581_s7 + $0x254] sm:$0xf0] }
 0x537   :  { %1482 = vmatpush.bf16.msrb.mxu0 %v3043_v37  ;;  %v3247_v37 = vor.u32 %v3742_v30, %v3246_v29  ;;  %v3198_v29 = vld [vmem:[%s5581_s7 + $0x100] sm:$0xf]  ;;  %v3730_v30 = vld [vmem:[%s5581_s7 + $0x104] sm:$0xf0] }
 0x538   :  { %1974 = vmatpush.bf16.msrb.mxu1 %v3119_v56  ;;  %v3303_v56 = vor.u32 %v3756_v44, %v3302_v43  ;;  %v3199_v34 = vor.u32 %v3730_v30, %v3198_v29  ;;  %v3184_v43 = vld [vmem:[%s5581_s7 + $0xe8] sm:$0xf0]  ;;  %v3707_v44 = vld [vmem:[%s5581_s7 + $0x54] sm:$0xf]  ;;  %v3144_v30 = vld [vmem:[%s5581_s7 + $0x98] sm:$0xf0] }
 0x539   :  { %1472 = vmatpush.bf16.msrb.mxu2 %v3007_v20  ;;  %1990 = vmatpush.bf16.msra.mxu3 %v3167_v22  ;;  %v3750_v22 = vld [vmem:[%s5581_s7 + $0x1a4] sm:$0xf0]  ;;  %v3715_v29 = vld [vmem:[%s5581_s7 + $0x94] sm:$0xf] }
 0x53b   :  { %1483 = vmatpush.bf16.msrb.mxu0 %v3035_v48  ;;  %v3700_v48 = vld [vmem:[%s5581_s7 + $0x14] sm:$0xf0] }
 0x53c   :  { %1975 = vmatpush.bf16.msrb.mxu1 %v3111_v3  ;;  %1473 = vmatmul.bf16.vlgmr.msrb.gmra.mxu2 %v3861_v52  ;;  %v3079_v55 = vor.u32 %v3700_v48, %v3078_v47  ;;  %v3382_v3 = vld [vmem:[%s5581_s7 + $0x270] sm:$0xf]  ;;  %v3723_v48 = vld [vmem:[%s5581_s7 + $0xd4] sm:$0xf] }
 0x53d   :  { %2001 = vmatpush.bf16.msra.mxu2 %v3255_v25  ;;  %1991 = vmatpush.bf16.msra.mxu3 %v3159_v14  ;;  %v3383_v15 = vor.u32 %v3776_v4, %v3382_v3  ;;  %v3279_v25 = vor.u32 %v3750_v22, %v3278_v21  ;;  %v3746_v14 = vld [vmem:[%s5581_s7 + $0x184] sm:$0xf0]  ;;  %v3179_v50 = vor.u32 %v3723_v48, %v3176_v49  ;;  %v3160_v3 = vld [vmem:[%s5581_s7 + $0xb8] sm:$0xf0]  ;;  %v3422_v22 = vld [vmem:[%s5581_s7 + $0x2c0] sm:$0xf] }
 0x53e   :  { %v3770_v21 = vld [vmem:[%s5581_s7 + $0x244] sm:$0xf0]  ;;  %v3764_v48 = vld [vmem:[%s5581_s7 + $0x214] sm:$0xf0]  ;;  %v3398_v49 = vld [vmem:[%s5581_s7 + $0x290] sm:$0xf] }
 0x53f   :  { %1484 = vmatpush.bf16.msrb.mxu0 %v3027_v0  ;;  %v3698_v0 = vld [vmem:[%s5581_s7 + $0x4] sm:$0xf0] }
 0x540   :  { %1976 = vmatpush.bf16.msrb.mxu1 %v3103_v19  ;;  %v3071_v5 = vor.u32 %v3698_v0, %v3070_v63  ;;  %v3287_v19 = vor.u32 %v3752_v13, %v3286_v12  ;;  %v3703_v63 = vld [vmem:[%s5581_s7 + $0x34] sm:$0xf]  ;;  %v3701_v13 = vld [vmem:[%s5581_s7 + $0x24] sm:$0xf] }
 0x541   :  { %2002 = vmatpush.bf16.msra.mxu2 %v3247_v37  ;;  %v3099_v4 = vor.u32 %v3703_v63, %v3096_v1 }
 0x543   :  { %1485 = vmatpush.bf16.msrb.mxu0 %v3019_v16  ;;  %3002 = vmatmul.msk.bf16.vlgmr.msra.gmra.mxu1 %vm228_vm0, %v4635_v35  ;;  %v3150_v35 = vld [vmem:[%s5581_s7 + $0xa0] sm:$0xf] }
 0x544   :  { %1977 = vmatpush.bf16.msrb.mxu1 %v3095_v32  ;;  %v3151_v45 = vor.u32 %v3718_v41, %v3150_v35  ;;  %v3214_v16 = vld [vmem:[%s5581_s7 + $0x120] sm:$0xf]  ;;  %v3128_v32 = vld [vmem:[%s5581_s7 + $0x78] sm:$0xf0]  ;;  %v3263_v35 = vor.u32 %v3746_v14, %v3262_v36  ;;  %v3195_v41 = vor.u32 %v3727_v38, %v3192_v39  ;;  %v3784_v14 = vld [vmem:[%s5581_s7 + $0x2b4] sm:$0xf0] }
 0x545   :  { %2003 = vmatpush.bf16.msra.mxu2 %v3239_v46  ;;  %v3215_v20 = vor.u32 %v3734_v17, %v3214_v16  ;;  %v3717_v16 = vld [vmem:[%s5581_s7 + $0xa4] sm:$0xf]  ;;  %v3072_v39 = vld [vmem:[%s5581_s7 + $0x8] sm:$0xf0] }
 0x546   :  { %1992 = vmatpush.bf16.msra.mxu3 %v3151_v45  ;;  %v3112_v45 = vld [vmem:[%s5581_s7 + $0x58] sm:$0xf0]  ;;  %v3697_v38 = vld [vmem:[%s5581_s7 + $0x4] sm:$0xf] }
 0x547   :  { %1486 = vmatpush.bf16.msrb.mxu0 %v3011_v31  ;;  %v3711_v31 = vld [vmem:[%s5581_s7 + $0x74] sm:$0xf]  ;;  %v3115_v47 = vor.u32 %v3707_v44, %v3112_v45  ;;  %v3782_v44 = vld [vmem:[%s5581_s7 + $0x2a4] sm:$0xf0] }
 0x548   :  { %1978 = vmatpush.bf16.msrb.mxu1 %v3087_v42  ;;  %v3131_v37 = vor.u32 %v3711_v31, %v3128_v32  ;;  %v3123_v42 = vor.u32 %v3709_v61, %v3120_v40  ;;  %v3147_v31 = vor.u32 %v3715_v29, %v3144_v30  ;;  %v3350_v32 = vld [vmem:[%s5581_s7 + $0x230] sm:$0xf]  ;;  %v3713_v61 = vld [vmem:[%s5581_s7 + $0x84] sm:$0xf]  ;;  %v3075_v40 = vor.u32 %v3697_v38, %v3072_v39  ;;  %v3735_v38 = vld [vmem:[%s5581_s7 + $0x134] sm:$0xf] }
 0x549   :  { %2004 = vmatpush.bf16.msra.mxu2 %v3231_v62  ;;  %v3790_v62 = vld [vmem:[%s5581_s7 + $0x2e4] sm:$0xf0]  ;;  %v3224_v39 = vld [vmem:[%s5581_s7 + $0x138] sm:$0xf0] }
 0x54a   :  { %1487 = vmatmul.bf16.vlgmr.msrb.gmra.mxu0 %v3861_v52  ;;  %1993 = vmatpush.bf16.msra.mxu3 %v3143_v60  ;;  %v3104_v52 = vld [vmem:[%s5581_s7 + $0x48] sm:$0xf0]  ;;  %v3438_v60 = vld [vmem:[%s5581_s7 + $0x2e0] sm:$0xf] }
 0x54b   :  { %2015 = vmatpush.bf16.msra.mxu0 %v3319_v33  ;;  %v3271_v33 = vor.u32 %v3748_v28, %v3270_v27  ;;  %v3107_v54 = vor.u32 %v3705_v51, %v3104_v52  ;;  %v3439_v0 = vor.u32 %v3790_v62, %v3438_v60  ;;  %v3423_v27 = vor.u32 %v3786_v24, %v3422_v22  ;;  %v3780_v51 = vld [vmem:[%s5581_s7 + $0x294] sm:$0xf0]  ;;  %v3743_v60 = vld [vmem:[%s5581_s7 + $0x174] sm:$0xf]  ;;  %v3256_v62 = vld [vmem:[%s5581_s7 + $0x178] sm:$0xf0] }
 0x54c   :  { %1979 = vmatpush.bf16.msrb.mxu1 %v3079_v55  ;;  %v3168_v55 = vld [vmem:[%s5581_s7 + $0xc8] sm:$0xf0]  ;;  %v3399_v52 = vor.u32 %v3780_v51, %v3398_v49  ;;  %v3789_v24 = vld [vmem:[%s5581_s7 + $0x2e4] sm:$0xf] }
 0x54d   :  { %2005 = vmatpush.bf16.msra.mxu2 %v3223_v10  ;;  %v3171_v58 = vor.u32 %v3721_v53, %v3168_v55  ;;  %v3788_v10 = vld [vmem:[%s5581_s7 + $0x2d4] sm:$0xf0]  ;;  %v3326_v53 = vld [vmem:[%s5581_s7 + $0x200] sm:$0xf]  ;;  %v3733_v49 = vld [vmem:[%s5581_s7 + $0x124] sm:$0xf] }
 0x54e   :  { %1994 = vmatpush.bf16.msra.mxu3 %v3135_v9  ;;  %v3367_v9 = vor.u32 %v3772_v7, %v3366_v6  ;;  %v3775_v6 = vld [vmem:[%s5581_s7 + $0x274] sm:$0xf]  ;;  %v3384_v7 = vld [vmem:[%s5581_s7 + $0x278] sm:$0xf0] }
 0x54f   :  { %2016 = vmatpush.bf16.msra.mxu0 %v3311_v11  ;;  %v3725_v11 = vld [vmem:[%s5581_s7 + $0xe4] sm:$0xf] }
 0x550   :  { %1980 = vmatpush.bf16.msrb.mxu1 %v3071_v5  ;;  %v3187_v46 = vor.u32 %v3725_v11, %v3184_v43  ;;  %v3163_v5 = vor.u32 %v3719_v2, %v3160_v3  ;;  %v3766_v11 = vld [vmem:[%s5581_s7 + $0x224] sm:$0xf0]  ;;  %v3406_v43 = vld [vmem:[%s5581_s7 + $0x2a0] sm:$0xf]  ;;  %v3259_v2 = vor.u32 %v3743_v60, %v3256_v62  ;;  %v3304_v62 = vld [vmem:[%s5581_s7 + $0x1d8] sm:$0xf0] }
 0x551   :  { %2006 = vmatpush.bf16.msra.mxu2 %v3215_v20  ;;  %v3358_v20 = vld [vmem:[%s5581_s7 + $0x240] sm:$0xf] }
 0x552   :  { %2043 = vmatpush.bf16.msrb.mxu3 %v3447_v18  ;;  %v3152_v18 = vld [vmem:[%s5581_s7 + $0xa8] sm:$0xf0]  ;;  %v3359_v23 = vor.u32 %v3770_v21, %v3358_v20  ;;  %v3773_v20 = vld [vmem:[%s5581_s7 + $0x264] sm:$0xf] }
 0x553   :  { %2017 = vmatpush.bf16.msra.mxu0 %v3303_v56  ;;  %v3374_v56 = vld [vmem:[%s5581_s7 + $0x260] sm:$0xf]  ;;  %v3376_v21 = vld [vmem:[%s5581_s7 + $0x268] sm:$0xf0] }
 0x554   :  { %2029 = vmatpush.bf16.msra.mxu1 %v3383_v15  ;;  %v3375_v59 = vor.u32 %v3774_v57, %v3374_v56  ;;  %v3088_v15 = vld [vmem:[%s5581_s7 + $0x28] sm:$0xf0]  ;;  %v3390_v56 = vld [vmem:[%s5581_s7 + $0x280] sm:$0xf]  ;;  %v3778_v57 = vld [vmem:[%s5581_s7 + $0x284] sm:$0xf0]  ;;  %v3379_v29 = vor.u32 %v3773_v20, %v3376_v21 }
 0x555   :  { %2007 = vmatpush.bf16.msra.mxu2 %v3207_v26  ;;  %v3091_v17 = vor.u32 %v3701_v13, %v3088_v15  ;;  %v3080_v26 = vld [vmem:[%s5581_s7 + $0x18] sm:$0xf0] }
 0x556   :  { %2044 = vmatpush.bf16.msrb.mxu3 %v3439_v0  ;;  %v3240_v13 = vld [vmem:[%s5581_s7 + $0x158] sm:$0xf0] }
 0x557   :  { %2018 = vmatpush.bf16.msra.mxu0 %v3295_v8  ;;  %v3430_v8 = vld [vmem:[%s5581_s7 + $0x2d0] sm:$0xf]  ;;  %v3336_v20 = vld [vmem:[%s5581_s7 + $0x218] sm:$0xf0] }
 0x558   :  { %2030 = vmatpush.bf16.msra.mxu1 %v3375_v59  ;;  %v3431_v12 = vor.u32 %v3788_v10, %v3430_v8  ;;  %v3791_v8 = vld [vmem:[%s5581_s7 + $0x2f4] sm:$0xf] }
 0x559   :  { %2008 = vmatpush.bf16.msra.mxu2 %v3199_v34  ;;  %v3414_v34 = vld [vmem:[%s5581_s7 + $0x2b0] sm:$0xf] }
 0x55a   :  { %2045 = vmatpush.bf16.msrb.mxu3 %v3431_v12  ;;  %v3739_v12 = vld [vmem:[%s5581_s7 + $0x154] sm:$0xf] }
 0x55b   :  { %2019 = vmatpush.bf16.msra.mxu0 %v3287_v19  ;;  %v3155_v19 = vor.u32 %v3717_v16, %v3152_v18  ;;  %v3387_v16 = vor.u32 %v3775_v6, %v3384_v7 }
 0x55c   :  { %2031 = vmatpush.bf16.msra.mxu1 %v3367_v9  ;;  %v3448_v9 = vld [vmem:[%s5581_s7 + $0x2f8] sm:$0xf0] }
 0x55d   :  { %2057 = vmatpush.bf16.msrb.mxu2 %v3131_v37  ;;  %v3415_v37 = vor.u32 %v3784_v14, %v3414_v34  ;;  %v3432_v34 = vld [vmem:[%s5581_s7 + $0x2d8] sm:$0xf0] }
 0x55e   :  { %2046 = vmatpush.bf16.msrb.mxu3 %v3423_v27  ;;  %v3737_v27 = vld [vmem:[%s5581_s7 + $0x144] sm:$0xf] }
 0x55f   :  { %2020 = vmatpush.bf16.msra.mxu0 %v3279_v25  ;;  %v3699_v25 = vld [vmem:[%s5581_s7 + $0x14] sm:$0xf] }
 0x560   :  { %v3083_v28 = vor.u32 %v3699_v25, %v3080_v26  ;;  %2032 = vmatpush.bf16.msra.mxu1 %v3359_v23  ;;  %v3440_v25 = vld [vmem:[%s5581_s7 + $0x2e8] sm:$0xf0]  ;;  %v3243_v26 = vor.u32 %v3739_v12, %v3240_v13 }
 0x561   :  { %2058 = vmatpush.bf16.msrb.mxu2 %v3123_v42  ;;  %v3342_v42 = vld [vmem:[%s5581_s7 + $0x220] sm:$0xf]  ;;  %v3443_v30 = vor.u32 %v3789_v24, %v3440_v25  ;;  %v3296_v13 = vld [vmem:[%s5581_s7 + $0x1c8] sm:$0xf0]  ;;  %v3400_v24 = vld [vmem:[%s5581_s7 + $0x298] sm:$0xf0] }
 0x562   :  { %2047 = vmatpush.bf16.msrb.mxu3 %v3415_v37  ;;  %v3343_v45 = vor.u32 %v3766_v11, %v3342_v42  ;;  %v3320_v37 = vld [vmem:[%s5581_s7 + $0x1f8] sm:$0xf0] }
 0x563   :  { %2021 = vmatpush.bf16.msra.mxu0 %v3271_v33  ;;  %v3768_v33 = vld [vmem:[%s5581_s7 + $0x234] sm:$0xf0] }
 0x564   :  { %v3351_v36 = vor.u32 %v3768_v33, %v3350_v32  ;;  %v3368_v32 = vld [vmem:[%s5581_s7 + $0x258] sm:$0xf0]  ;;  %v3787_v33 = vld [vmem:[%s5581_s7 + $0x2d4] sm:$0xf] }
 0x565   :  { %2059 = vmatpush.bf16.msrb.mxu2 %v3115_v47  ;;  %v3334_v47 = vld [vmem:[%s5581_s7 + $0x210] sm:$0xf] }
 0x566   :  { %2033 = vmatpush.bf16.msra.mxu1 %v3351_v36  ;;  %v3759_v36 = vld [vmem:[%s5581_s7 + $0x1f4] sm:$0xf] }
 0x567   :  { %2022 = vmatpush.bf16.msra.mxu0 %v3263_v35  ;;  %v3136_v35 = vld [vmem:[%s5581_s7 + $0x88] sm:$0xf0]  ;;  %v3323_v11 = vor.u32 %v3759_v36, %v3320_v37 }
 0x568   :  { %v3392_v36 = vld [vmem:[%s5581_s7 + $0x288] sm:$0xf0] }
 0x569   :  { %2060 = vmatpush.bf16.msrb.mxu2 %v3107_v54  ;;  %v3762_v54 = vld [vmem:[%s5581_s7 + $0x204] sm:$0xf0] }
 0x56a   :  { %2034 = vmatpush.bf16.msra.mxu1 %v3343_v45  ;;  %v3327_v55 = vor.u32 %v3762_v54, %v3326_v53  ;;  %v3757_v45 = vld [vmem:[%s5581_s7 + $0x1e4] sm:$0xf]  ;;  %v3767_v53 = vld [vmem:[%s5581_s7 + $0x234] sm:$0xf]  ;;  %v3352_v54 = vld [vmem:[%s5581_s7 + $0x238] sm:$0xf0] }
 0x56b   :  { %2071 = vmatpush.bf16.msrb.mxu0 %v3195_v41  ;;  %v3139_v41 = vor.u32 %v3713_v61, %v3136_v35  ;;  %v3769_v35 = vld [vmem:[%s5581_s7 + $0x244] sm:$0xf] }
 0x56d   :  { %2061 = vmatpush.bf16.msrb.mxu2 %v3099_v4  ;;  %v3741_v4 = vld [vmem:[%s5581_s7 + $0x164] sm:$0xf] }
 0x56f   :  { %2072 = vmatpush.bf16.msrb.mxu0 %v3187_v46  ;;  %v3407_v46 = vor.u32 %v3782_v44, %v3406_v43  ;;  %v3785_v43 = vld [vmem:[%s5581_s7 + $0x2c4] sm:$0xf]  ;;  %v3424_v44 = vld [vmem:[%s5581_s7 + $0x2c8] sm:$0xf0] }
 0x571   :  { %2062 = vmatpush.bf16.msrb.mxu2 %v3091_v17  ;;  %2048 = vmatpush.bf16.msrb.mxu3 %v3407_v46  ;;  %v3227_v46 = vor.u32 %v3735_v38, %v3224_v39 }
 0x573   :  { %2073 = vmatpush.bf16.msrb.mxu0 %v3179_v50  ;;  %v3335_v50 = vor.u32 %v3764_v48, %v3334_v47  ;;  %v3312_v48 = vld [vmem:[%s5581_s7 + $0x1e8] sm:$0xf0] }
 0x575   :  { %2063 = vmatpush.bf16.msrb.mxu2 %v3083_v28  ;;  %2035 = vmatpush.bf16.msra.mxu1 %v3335_v50  ;;  %v3232_v28 = vld [vmem:[%s5581_s7 + $0x148] sm:$0xf0] }
 0x576   :  { %2049 = vmatpush.bf16.msrb.mxu3 %v3399_v52  ;;  %v3235_v14 = vor.u32 %v3737_v27, %v3232_v28  ;;  %v3216_v50 = vld [vmem:[%s5581_s7 + $0x128] sm:$0xf0]  ;;  %v3427_v52 = vor.u32 %v3785_v43, %v3424_v44  ;;  %v3751_v27 = vld [vmem:[%s5581_s7 + $0x1b4] sm:$0xf]  ;;  %v3288_v28 = vld [vmem:[%s5581_s7 + $0x1b8] sm:$0xf0] }
 0x577   :  { %2074 = vmatpush.bf16.msrb.mxu0 %v3171_v58  ;;  %v3391_v58 = vor.u32 %v3778_v57, %v3390_v56  ;;  %v3783_v56 = vld [vmem:[%s5581_s7 + $0x2b4] sm:$0xf]  ;;  %v3416_v57 = vld [vmem:[%s5581_s7 + $0x2b8] sm:$0xf0]  ;;  %v3291_v37 = vor.u32 %v3751_v27, %v3288_v28  ;;  %v3745_v44 = vld [vmem:[%s5581_s7 + $0x184] sm:$0xf] }
 0x579   :  { %2064 = vmatpush.bf16.msrb.mxu2 %v3075_v40  ;;  %2036 = vmatpush.bf16.msra.mxu1 %v3327_v55  ;;  %v3435_v40 = vor.u32 %v3787_v33, %v3432_v34  ;;  %v3315_v55 = vor.u32 %v3757_v45, %v3312_v48  ;;  %v3777_v34 = vld [vmem:[%s5581_s7 + $0x284] sm:$0xf]  ;;  %v3264_v45 = vld [vmem:[%s5581_s7 + $0x188] sm:$0xf0]  ;;  %v3824_v48 = vld [vmem:[%s5565_s15 + $0x74] sm:$0xf0] }
 0x57a   :  { %2050 = vmatpush.bf16.msrb.mxu3 %v3391_v58  ;;  %v3755_v58 = vld [vmem:[%s5581_s7 + $0x1d4] sm:$0xf] }
 0x57b   :  { %2075 = vmatpush.bf16.msrb.mxu0 %v3163_v5  ;;  %v3248_v5 = vld [vmem:[%s5581_s7 + $0x168] sm:$0xf0]  ;;  %v3307_v7 = vor.u32 %v3755_v58, %v3304_v62  ;;  %v3819_v62 = vld [vmem:[%s5565_s15 + $0x54] sm:$0xf] }
 0x57c   :  { %v3251_v10 = vor.u32 %v3741_v4, %v3248_v5  ;;  %v3765_v4 = vld [vmem:[%s5581_s7 + $0x224] sm:$0xf]  ;;  %v3344_v5 = vld [vmem:[%s5581_s7 + $0x228] sm:$0xf0] }
 0x57f   :  { %2076 = vmatpush.bf16.msrb.mxu0 %v3155_v19  ;;  %v3451_v19 = vor.u32 %v3791_v8, %v3448_v9  ;;  %v3781_v8 = vld [vmem:[%s5581_s7 + $0x2a4] sm:$0xf]  ;;  %v3408_v9 = vld [vmem:[%s5581_s7 + $0x2a8] sm:$0xf0] }
 0x583   :  { %2077 = vmatpush.bf16.msrb.mxu0 %v3147_v31  ;;  %v3771_v31 = vld [vmem:[%s5581_s7 + $0x254] sm:$0xf] }
 0x584   :  { %v3371_v61 = vor.u32 %v3771_v31, %v3368_v32  ;;  %v3761_v31 = vld [vmem:[%s5581_s7 + $0x204] sm:$0xf]  ;;  %v3328_v32 = vld [vmem:[%s5581_s7 + $0x208] sm:$0xf0] }
 0x585   :  { %v3331_v39 = vor.u32 %v3761_v31, %v3328_v32 }
 0x587   :  { %2078 = vmatpush.bf16.msrb.mxu0 %v3139_v41  ;;  %v3360_v41 = vld [vmem:[%s5581_s7 + $0x248] sm:$0xf0] }
 0x588   :  { %v3363_v51 = vor.u32 %v3769_v35, %v3360_v41  ;;  %v3395_v35 = vor.u32 %v3777_v34, %v3392_v36  ;;  %v3462_v34 = vld [vmem:[%s5565_s15 + $0x10] sm:$0xf]  ;;  %v3812_v36 = vld [vmem:[%s5565_s15 + $0x14] sm:$0xf0] }
 0x5a0   :  { %v1170_v59 = vpop.f32.mrf.mxu1 }
 0x5a6   :  { %v1209_v63 = vpop.f32.mrf.mxu3 }
 0x5a7   :  { %v1223_v0 = vpop.f32.mrf.mxu0 }
 0x5a8   :  { %v1172_v1 = vpop.f32.mrf.mxu1 }
 0x5a9   :  { %v5083_v3 = vpack.c.bf16 %v1172_v1, %v1170_v59  ;;  %v3219_v59 = vor.u32 %v3733_v49, %v3216_v50  ;;  %v3355_v1 = vor.u32 %v3767_v53, %v3352_v54  ;;  %v3823_v49 = vld [vmem:[%s5565_s15 + $0x74] sm:$0xf]  ;;  %v3821_v53 = vld [vmem:[%s5565_s15 + $0x64] sm:$0xf] }
 0x5ab   :  { %1981 = vmatmul.bf16.vlgmr.msrb.gmra.mxu1 %v5083_v3 }
 0x5ac   :  { %2085 = vmatpush.bf16.msrb.mxu1 %v3259_v2  ;;  %v3419_v2 = vor.u32 %v3783_v56, %v3416_v57 }
 0x5ae   :  { %v1211_v15 = vpop.f32.mrf.mxu3 }
 0x5af   :  { %v5110_v17 = vpack.c.bf16 %v1211_v15, %v1209_v63  ;;  %v1225_v18 = vpop.f32.mrf.mxu0  ;;  %v3731_v63 = vld [vmem:[%s5581_s7 + $0x114] sm:$0xf]  ;;  %v3729_v15 = vld [vmem:[%s5581_s7 + $0x104] sm:$0xf] }
 0x5b0   :  { %v5118_v22 = vpack.c.bf16 %v1225_v18, %v1223_v0  ;;  %v1184_v23 = vpop.f32.mrf.mxu1  ;;  %2086 = vmatpush.bf16.msrb.mxu1 %v3251_v10  ;;  %v3208_v0 = vld [vmem:[%s5581_s7 + $0x118] sm:$0xf0]  ;;  %v3753_v10 = vld [vmem:[%s5581_s7 + $0x1c4] sm:$0xf]  ;;  %v3347_v18 = vor.u32 %v3765_v4, %v3344_v5  ;;  %v3818_v4 = vld [vmem:[%s5565_s15 + $0x44] sm:$0xf0] }
 0x5b1   :  { %2009 = vmatmul.bf16.vlgmr.msra.gmra.mxu2 %v5110_v17  ;;  %v3211_v12 = vor.u32 %v3731_v63, %v3208_v0  ;;  %v3299_v21 = vor.u32 %v3753_v10, %v3296_v13  ;;  %v3496_v0 = vld [vmem:[%s5565_s15 + $0x58] sm:$0xf0]  ;;  %v3817_v5 = vld [vmem:[%s5565_s15 + $0x44] sm:$0xf]  ;;  %v3816_v13 = vld [vmem:[%s5565_s15 + $0x34] sm:$0xf0] }
 0x5b2   :  { %2023 = vmatmul.bf16.vlgmr.msra.gmra.mxu0 %v5118_v22  ;;  %2113 = vmatpush.bf16.msra.mxu2 %v3387_v16  ;;  %v3200_v16 = vld [vmem:[%s5581_s7 + $0x108] sm:$0xf0] }
 0x5b3   :  { %2127 = vmatpush.bf16.msra.mxu0 %v3451_v19  ;;  %v3411_v19 = vor.u32 %v3781_v8, %v3408_v9  ;;  %v3203_v25 = vor.u32 %v3729_v15, %v3200_v16  ;;  %v3815_v15 = vld [vmem:[%s5565_s15 + $0x34] sm:$0xf] }
 0x5b4   :  { %2087 = vmatpush.bf16.msrb.mxu1 %v3243_v26 }
 0x5b6   :  { %2114 = vmatpush.bf16.msra.mxu2 %v3379_v29 }
 0x5b7   :  { %2128 = vmatpush.bf16.msra.mxu0 %v3443_v30  ;;  %v1262_v60 = vpop.f32.mrf.mxu3 }
 0x5b8   :  { %v1186_v42 = vpop.f32.mrf.mxu1  ;;  %2088 = vmatpush.bf16.msrb.mxu1 %v3235_v14 }
 0x5b9   :  { %v1364_v47 = vpack.c.bf16 %v1186_v42, %v1184_v23  ;;  %v3779_v23 = vld [vmem:[%s5581_s7 + $0x294] sm:$0xf] }
 0x5ba   :  { %2115 = vmatpush.bf16.msra.mxu2 %v3371_v61  ;;  %v3403_v30 = vor.u32 %v3779_v23, %v3400_v24  ;;  %v3749_v61 = vld [vmem:[%s5581_s7 + $0x1a4] sm:$0xf]  ;;  %v3747_v42 = vld [vmem:[%s5581_s7 + $0x194] sm:$0xf]  ;;  %v3840_v24 = vld [vmem:[%s5565_s15 + $0xf4] sm:$0xf0] }
 0x5bb   :  { %2129 = vmatpush.bf16.msra.mxu0 %v3435_v40  ;;  %1995 = vmatmul.bf16.vlgmr.msra.gmra.mxu3 %v1364_v47  ;;  %v3280_v40 = vld [vmem:[%s5581_s7 + $0x1a8] sm:$0xf0] }
 0x5bc   :  { %2099 = vmatpush.bf16.msra.mxu3 %v3323_v11  ;;  %2089 = vmatpush.bf16.msrb.mxu1 %v3227_v46  ;;  %v3283_v41 = vor.u32 %v3749_v61, %v3280_v40  ;;  %v3272_v11 = vld [vmem:[%s5581_s7 + $0x198] sm:$0xf0]  ;;  %v3267_v46 = vor.u32 %v3745_v44, %v3264_v45  ;;  %v3454_v44 = vld [vmem:[%s5565_s15] sm:$0xf]  ;;  %v3810_v45 = vld [vmem:[%s5565_s15 + $0x4] sm:$0xf0] }
 0x5bd   :  { %v3275_v43 = vor.u32 %v3747_v42, %v3272_v11  ;;  %v3464_v61 = vld [vmem:[%s5565_s15 + $0x18] sm:$0xf0]  ;;  %v3837_v42 = vld [vmem:[%s5565_s15 + $0xe4] sm:$0xf]  ;;  %v3568_v11 = vld [vmem:[%s5565_s15 + $0xe8] sm:$0xf0] }
 0x5be   :  { %2116 = vmatpush.bf16.msra.mxu2 %v3363_v51  ;;  %v3512_v51 = vld [vmem:[%s5565_s15 + $0x78] sm:$0xf0] }
 0x5bf   :  { %2130 = vmatpush.bf16.msra.mxu0 %v3427_v52  ;;  %v1264_v29 = vpop.f32.mrf.mxu3  ;;  %v3822_v52 = vld [vmem:[%s5565_s15 + $0x64] sm:$0xf0]  ;;  %v5307_v57 = vpop.f32.mrf.mxu2 }
 0x5c0   :  { %v1248_v6 = vpop.f32.mrf.mxu1  ;;  %2100 = vmatpush.bf16.msra.mxu3 %v3315_v55  ;;  %2090 = vmatpush.bf16.msrb.mxu1 %v3219_v59  ;;  %v1368_v38 = vpack.c.bf16 %v1264_v29, %v1262_v60  ;;  %v3504_v55 = vld [vmem:[%s5565_s15 + $0x68] sm:$0xf0]  ;;  %v3494_v59 = vld [vmem:[%s5565_s15 + $0x50] sm:$0xf]  ;;  %v3820_v60 = vld [vmem:[%s5565_s15 + $0x54] sm:$0xf0] }
 0x5c1   :  { %2065 = vmatmul.bf16.vlgmr.msrb.gmra.mxu2 %v5083_v3  ;;  %v3763_v3 = vld [vmem:[%s5581_s7 + $0x214] sm:$0xf]  ;;  %v3507_v58 = vor.u32 %v3821_v53, %v3504_v55  ;;  %v3495_v63 = vor.u32 %v3820_v60, %v3494_v59  ;;  %v3550_v55 = vld [vmem:[%s5565_s15 + $0xc0] sm:$0xf]  ;;  %v3833_v59 = vld [vmem:[%s5565_s15 + $0xc4] sm:$0xf] }
 0x5c2   :  { %2079 = vmatmul.bf16.vlgmr.msrb.gmra.mxu0 %v1364_v47  ;;  %2117 = vmatpush.bf16.msra.mxu2 %v3355_v1  ;;  %v3339_v26 = vor.u32 %v3763_v3, %v3336_v20  ;;  %v3510_v47 = vld [vmem:[%s5565_s15 + $0x70] sm:$0xf]  ;;  %v3499_v1 = vor.u32 %v3819_v62, %v3496_v0  ;;  %v3470_v3 = vld [vmem:[%s5565_s15 + $0x20] sm:$0xf]  ;;  %v3814_v20 = vld [vmem:[%s5565_s15 + $0x24] sm:$0xf0] }
 0x5c3   :  { %2131 = vmatpush.bf16.msra.mxu0 %v3419_v2  ;;  %v3511_v50 = vor.u32 %v3824_v48, %v3510_v47  ;;  %v3486_v2 = vld [vmem:[%s5565_s15 + $0x40] sm:$0xf]  ;;  %v3471_v23 = vor.u32 %v3814_v20, %v3470_v3  ;;  %v3839_v29 = vld [vmem:[%s5565_s15 + $0xf4] sm:$0xf]  ;;  %v3455_v47 = vor.u32 %v3810_v45, %v3454_v44  ;;  %v3836_v48 = vld [vmem:[%s5565_s15 + $0xd4] sm:$0xf0] }
 0x5c4   :  { %2101 = vmatpush.bf16.msra.mxu3 %v3307_v7  ;;  %2091 = vmatpush.bf16.msrb.mxu1 %v3211_v12  ;;  %v3488_v7 = vld [vmem:[%s5565_s15 + $0x48] sm:$0xf0]  ;;  %v3478_v12 = vld [vmem:[%s5565_s15 + $0x30] sm:$0xf] }
 0x5c5   :  { %v3491_v8 = vor.u32 %v3817_v5, %v3488_v7  ;;  %v3479_v16 = vor.u32 %v3816_v13, %v3478_v12  ;;  %v3832_v5 = vld [vmem:[%s5565_s15 + $0xb4] sm:$0xf0] }
 0x5c6   :  { %2118 = vmatpush.bf16.msra.mxu2 %v3347_v18  ;;  %v3480_v18 = vld [vmem:[%s5565_s15 + $0x38] sm:$0xf0] }
 0x5c7   :  { %2132 = vmatpush.bf16.msra.mxu0 %v3411_v19  ;;  %v5305_v56 = vpop.f32.mrf.mxu0  ;;  %v5335_v10 = vpop.f32.mrf.mxu2  ;;  %v3483_v19 = vor.u32 %v3815_v15, %v3480_v18  ;;  %v3830_v18 = vld [vmem:[%s5565_s15 + $0xa4] sm:$0xf0] }
 0x5c8   :  { %v1250_v33 = vpop.f32.mrf.mxu1  ;;  %2102 = vmatpush.bf16.msra.mxu3 %v3299_v21  ;;  %2092 = vmatpush.bf16.msrb.mxu1 %v3203_v25  ;;  %v3574_v21 = vld [vmem:[%s5565_s15 + $0xf0] sm:$0xf]  ;;  %v3813_v25 = vld [vmem:[%s5565_s15 + $0x24] sm:$0xf] }
 0x5c9   :  { %v1367_v14 = vpack.c.bf16 %v1250_v33, %v1248_v6  ;;  %v3487_v6 = vor.u32 %v3818_v4, %v3486_v2  ;;  %v3575_v27 = vor.u32 %v3840_v24, %v3574_v21  ;;  %v3542_v4 = vld [vmem:[%s5565_s15 + $0xb0] sm:$0xf] }
 0x5ca   :  { %2119 = vmatpush.bf16.msra.mxu2 %v3339_v26  ;;  %v3472_v26 = vld [vmem:[%s5565_s15 + $0x28] sm:$0xf0]  ;;  %v3543_v7 = vor.u32 %v3832_v5, %v3542_v4 }
 0x5cb   :  { %2133 = vmatpush.bf16.msra.mxu0 %v3403_v30  ;;  %2037 = vmatmul.bf16.vlgmr.msra.gmra.mxu1 %v1367_v14  ;;  %v3475_v28 = vor.u32 %v3813_v25, %v3472_v26  ;;  %v3576_v30 = vld [vmem:[%s5565_s15 + $0xf8] sm:$0xf0]  ;;  %v3526_v26 = vld [vmem:[%s5565_s15 + $0x90] sm:$0xf] }
 0x5cc   :  { %2051 = vmatmul.bf16.vlgmr.msrb.gmra.mxu3 %v1368_v38  ;;  %2355 = vmatpush.bf16.msra.mxu1 %v3511_v50  ;;  %v3579_v32 = vor.u32 %v3839_v29, %v3576_v30  ;;  %v3456_v50 = vld [vmem:[%s5565_s15 + $0x8] sm:$0xf0] }
 0x5cd   :  { %2103 = vmatpush.bf16.msra.mxu3 %v3291_v37  ;;  %v3463_v37 = vor.u32 %v3812_v36, %v3462_v34 }
 0x5ce   :  { %2120 = vmatpush.bf16.msra.mxu2 %v3331_v39  ;;  %v3811_v39 = vld [vmem:[%s5565_s15 + $0x14] sm:$0xf] }
 0x5cf   :  { %2134 = vmatpush.bf16.msra.mxu0 %v3395_v35  ;;  %v5333_v9 = vpop.f32.mrf.mxu0 }
 0x5d1   :  { %2104 = vmatpush.bf16.msra.mxu3 %v3283_v41  ;;  %2121 = vmatmul.bf16.vlgmr.msra.gmra.mxu2 %v1367_v14  ;;  %v3566_v14 = vld [vmem:[%s5565_s15 + $0xe0] sm:$0xf]  ;;  %v3467_v41 = vor.u32 %v3811_v39, %v3464_v61 }
 0x5d2   :  { %2135 = vmatmul.bf16.vlgmr.msra.gmra.mxu0 %v1368_v38  ;;  %v3838_v38 = vld [vmem:[%s5565_s15 + $0xe4] sm:$0xf0] }
 0x5d3   :  { %2412 = vmatpush.bf16.msrb.mxu0 %v3579_v32  ;;  %v3567_v35 = vor.u32 %v3838_v38, %v3566_v14  ;;  %v3518_v14 = vld [vmem:[%s5565_s15 + $0x80] sm:$0xf] }
 0x5d5   :  { %2105 = vmatpush.bf16.msra.mxu3 %v3275_v43  ;;  %v3571_v43 = vor.u32 %v3837_v42, %v3568_v11  ;;  %v2141_v42 = vld [vmem:[%s5566_s13] sm:$0x3] }
 0x5d6   :  { %v2143_v45 = vperm.slane %v2141_v42, 0 }
 0x5d7   :  { %2413 = vmatpush.bf16.msrb.mxu0 %v3571_v43 }
 0x5d9   :  { %2106 = vmatpush.bf16.msra.mxu3 %v3267_v46  ;;  %v3558_v46 = vld [vmem:[%s5565_s15 + $0xd0] sm:$0xf] }
 0x5db   :  { %2093 = vmatmul.bf16.vlgmr.msrb.gmra.mxu1 %v5110_v17  ;;  %v3515_v17 = vor.u32 %v3823_v49, %v3512_v51  ;;  %v3809_v49 = vld [vmem:[%s5565_s15 + $0x4] sm:$0xf]  ;;  %v3559_v51 = vor.u32 %v3836_v48, %v3558_v46 }
 0x5dc   :  { %2107 = vmatmul.bf16.vlgmr.msra.gmra.mxu3 %v5118_v22  ;;  %v3502_v22 = vld [vmem:[%s5565_s15 + $0x60] sm:$0xf] }
 0x5dd   :  { %2393 = vmatpush.bf16.msrb.mxu2 %v3515_v17  ;;  %v3503_v54 = vor.u32 %v3822_v52, %v3502_v22  ;;  %2374 = vmatpush.bf16.msrb.mxu3 %v3575_v27  ;;  %v3459_v17 = vor.u32 %v3809_v49, %v3456_v50  ;;  %v3835_v22 = vld [vmem:[%s5565_s15 + $0xd4] sm:$0xf]  ;;  %v3560_v52 = vld [vmem:[%s5565_s15 + $0xd8] sm:$0xf0]  ;;  %v3828_v27 = vld [vmem:[%s5565_s15 + $0x94] sm:$0xf0] }
 0x5df   :  { %2356 = vmatpush.bf16.msra.mxu1 %v3503_v54  ;;  %v3563_v54 = vor.u32 %v3835_v22, %v3560_v52 }
 0x5e1   :  { %2394 = vmatpush.bf16.msrb.mxu2 %v3507_v58  ;;  %2375 = vmatpush.bf16.msrb.mxu3 %v3567_v35  ;;  %v3834_v58 = vld [vmem:[%s5565_s15 + $0xc4] sm:$0xf0] }
 0x5e2   :  { %2414 = vmatpush.bf16.msrb.mxu0 %v3563_v54  ;;  %v3551_v62 = vor.u32 %v3834_v58, %v3550_v55 }
 0x5e3   :  { %2357 = vmatpush.bf16.msra.mxu1 %v3495_v63  ;;  %v3552_v63 = vld [vmem:[%s5565_s15 + $0xc8] sm:$0xf0] }
 0x5e5   :  { %2395 = vmatpush.bf16.msrb.mxu2 %v3499_v1  ;;  %2376 = vmatpush.bf16.msrb.mxu3 %v3559_v51  ;;  %v3555_v1 = vor.u32 %v3833_v59, %v3552_v63 }
 0x5e7   :  { %2358 = vmatpush.bf16.msra.mxu1 %v3487_v6  ;;  %v3831_v6 = vld [vmem:[%s5565_s15 + $0xb4] sm:$0xf]  ;;  %2415 = vmatpush.bf16.msrb.mxu0 %v3555_v1 }
 0x5e9   :  { %2396 = vmatpush.bf16.msrb.mxu2 %v3491_v8  ;;  %2377 = vmatpush.bf16.msrb.mxu3 %v3551_v62  ;;  %v3544_v8 = vld [vmem:[%s5565_s15 + $0xb8] sm:$0xf0] }
 0x5ea   :  { %v3547_v12 = vor.u32 %v3831_v6, %v3544_v8 }
 0x5eb   :  { %2359 = vmatpush.bf16.msra.mxu1 %v3479_v16  ;;  %v3534_v16 = vld [vmem:[%s5565_s15 + $0xa0] sm:$0xf] }
 0x5ec   :  { %2416 = vmatpush.bf16.msrb.mxu0 %v3547_v12  ;;  %v3535_v21 = vor.u32 %v3830_v18, %v3534_v16 }
 0x5ed   :  { %2397 = vmatpush.bf16.msrb.mxu2 %v3483_v19  ;;  %2378 = vmatpush.bf16.msrb.mxu3 %v3543_v7  ;;  %v3829_v19 = vld [vmem:[%s5565_s15 + $0xa4] sm:$0xf]  ;;  %v2144_v7 = vperm.slane %v2141_v42, 1 }
 0x5ef   :  { %2360 = vmatpush.bf16.msra.mxu1 %v3471_v23 }
 0x5f1   :  { %2398 = vmatpush.bf16.msrb.mxu2 %v3475_v28  ;;  %2379 = vmatpush.bf16.msrb.mxu3 %v3535_v21  ;;  %v3827_v28 = vld [vmem:[%s5565_s15 + $0x94] sm:$0xf] }
 0x5f3   :  { %2361 = vmatpush.bf16.msra.mxu1 %v3463_v37  ;;  %v3826_v37 = vld [vmem:[%s5565_s15 + $0x84] sm:$0xf0] }
 0x5f4   :  { %v3519_v35 = vor.u32 %v3826_v37, %v3518_v14 }
 0x5f5   :  { %2399 = vmatpush.bf16.msrb.mxu2 %v3467_v41  ;;  %v3520_v41 = vld [vmem:[%s5565_s15 + $0x88] sm:$0xf0] }
 0x5f7   :  { %2362 = vmatpush.bf16.msra.mxu1 %v3455_v47 }
 0x5f9   :  { %2400 = vmatpush.bf16.msrb.mxu2 %v3459_v17 }
 0x628   :  { %v1982_v31 = vpop.f32.mrf.mxu1 }
 0x629   :  { %v1983_v13 = vadd.f32 %v1982_v31, %v5307_v57  ;;  %v3536_v57 = vld [vmem:[%s5565_s15 + $0xa8] sm:$0xf0]  ;;  %v3527_v31 = vor.u32 %v3828_v27, %v3526_v26 }
 0x62a   :  { %v3539_v23 = vor.u32 %v3829_v19, %v3536_v57 }
 0x62b   :  { %2380 = vmatpush.bf16.msrb.mxu3 %v3527_v31 }
 0x62c   :  { %2417 = vmatpush.bf16.msrb.mxu0 %v3539_v23 }
 0x62f   :  { %v5393_v40 = vpop.f32.mrf.mxu0  ;;  %2381 = vmatpush.bf16.msrb.mxu3 %v3519_v35 }
 0x630   :  { %v1984_v60 = vpop.f32.mrf.mxu1 }
 0x631   :  { %v1985_v24 = vadd.f32 %v1984_v60, %v5335_v10  ;;  %v3528_v10 = vld [vmem:[%s5565_s15 + $0x98] sm:$0xf0] }
 0x632   :  { %v3531_v34 = vor.u32 %v3827_v28, %v3528_v10 }
 0x634   :  { %v5373_v33 = vpop.f32.mrf.mxu2  ;;  %2418 = vmatpush.bf16.msrb.mxu0 %v3531_v34 }
 0x637   :  { %v2026_v2 = vpop.f32.mrf.mxu0 }
 0x63c   :  { %v2012_v0 = vpop.f32.mrf.mxu2 }
 0x63e   :  { %v1996_v53 = vpop.f32.mrf.mxu3 }
 0x63f   :  { %v1997_v3 = vadd.f32 %v1996_v53, %v1983_v13  ;;  %v2080_v32 = vpop.f32.mrf.mxu0 }
 0x641   :  { %v2011_v29 = vadd.f32 %v5373_v33, %v1997_v3  ;;  %v3825_v33 = vld [vmem:[%s5565_s15 + $0x84] sm:$0xf] }
 0x642   :  { %v3523_v11 = vor.u32 %v3825_v33, %v3520_v41 }
 0x643   :  { %v2025_v39 = vadd.f32 %v5393_v40, %v2011_v29 }
 0x644   :  { %v2066_v25 = vpop.f32.mrf.mxu2  ;;  %2419 = vmatpush.bf16.msrb.mxu0 %v3523_v11 }
 0x645   :  { %v2067_v50 = vadd.f32 %v2066_v25, %v5305_v56 }
 0x646   :  { %v1998_v15 = vpop.f32.mrf.mxu3 }
 0x647   :  { %v1999_v30 = vadd.f32 %v1998_v15, %v1985_v24  ;;  %v2082_v48 = vpop.f32.mrf.mxu0  ;;  %v2081_v55 = vadd.f32 %v2080_v32, %v2067_v50 }
 0x648   :  { %v2038_v20 = vpop.f32.mrf.mxu1 }
 0x649   :  { %v2013_v38 = vadd.f32 %v2012_v0, %v1999_v30  ;;  %v2039_v43 = vadd.f32 %v2038_v20, %v2025_v39 }
 0x64b   :  { %v2027_v46 = vadd.f32 %v2026_v2, %v2013_v38 }
 0x64c   :  { %v2068_v47 = vpop.f32.mrf.mxu2 }
 0x64d   :  { %v2069_v63 = vadd.f32 %v2068_v47, %v5333_v9 }
 0x64f   :  { %v2052_v36 = vpop.f32.mrf.mxu3  ;;  %v2136_v56 = vpop.f32.mrf.mxu0  ;;  %v2083_v4 = vadd.f32 %v2082_v48, %v2069_v63 }
 0x650   :  { %v2040_v61 = vpop.f32.mrf.mxu1  ;;  %v2053_v44 = vadd.f32 %v2052_v36, %v2039_v43 }
 0x651   :  { %v2041_v40 = vadd.f32 %v2040_v61, %v2027_v46 }
 0x652   :  { %v2147_v51 = vadd.f32 %v2143_v45, %v2053_v44 }
 0x654   :  { %v5493_v53 = vmax.f32 %v2147_v51, 0.0  ;;  %v2122_v60 = vpop.f32.mrf.mxu2 }
 0x656   :  { %v2155_v3 = vmul.f32 %v5493_v53, %v5493_v53 }
 0x657   :  { %v2054_v49 = vpop.f32.mrf.mxu3  ;;  %v2138_v18 = vpop.f32.mrf.mxu0 }
 0x658   :  { %v2055_v17 = vadd.f32 %v2054_v49, %v2041_v40  ;;  %v2094_v22 = vpop.f32.mrf.mxu1 }
 0x659   :  { %v2095_v58 = vadd.f32 %v2094_v22, %v2081_v55 }
 0x65a   :  { %v2149_v52 = vadd.f32 %v2143_v45, %v2055_v17 }
 0x65c   :  { %v5495_v54 = vmax.f32 %v2149_v52, 0.0  ;;  %v2124_v13 = vpop.f32.mrf.mxu2 }
 0x65e   :  { %v2191_v59 = vpack.c.bf16 %v5495_v54, %v5493_v53  ;;  %v2157_v16 = vmul.f32 %v5495_v54, %v5495_v54 }
 0x65f   :  { %v2108_v62 = vpop.f32.mrf.mxu3 }
 0x660   :  { %v2109_v0 = vadd.f32 %v2108_v62, %v2095_v58  ;;  %2363 = vmatmul.bf16.vlgmr.msra.gmra.mxu1 %v2191_v59  ;;  %2401 = vmatmul.bf16.vlgmr.msrb.gmra.mxu2 %v2191_v59  ;;  %v2096_v1 = vpop.f32.mrf.mxu1  ;;  %v2193_v21 = vpack.c.bf16 %v2157_v16, %v2155_v3 }
 0x661   :  { %v2097_v5 = vadd.f32 %v2096_v1, %v2083_v4 }
 0x662   :  { %v2123_v2 = vadd.f32 %v2122_v60, %v2109_v0 }
 0x664   :  { %v2137_v8 = vadd.f32 %v2136_v56, %v2123_v2 }
 0x666   :  { %v2148_v19 = vadd.f32 %v2144_v7, %v2137_v8 }
 0x667   :  { %v2110_v6 = vpop.f32.mrf.mxu3 }
 0x668   :  { %v2111_v12 = vadd.f32 %v2110_v6, %v2097_v5  ;;  %v5504_v57 = vmax.f32 %v2148_v19, 0.0 }
 0x66a   :  { %v2125_v15 = vadd.f32 %v2124_v13, %v2111_v12  ;;  %v2156_v26 = vmul.f32 %v5504_v57, %v5504_v57  ;;  %v2495_v12 = vld [vmem:[%s5567_s16] sm:$0x3] }
 0x66c   :  { %v2139_v9 = vadd.f32 %v2138_v18, %v2125_v15  ;;  %v2505_v18 = vld [vmem:[%s5568_s17] sm:$0x3] }
 0x66e   :  { %v2150_v20 = vadd.f32 %v2144_v7, %v2139_v9 }
 0x670   :  { %v5506_v23 = vmax.f32 %v2150_v20, 0.0  ;;  %2368 = vmatmul.bf16.gmra.mxu1 %v2193_v21  ;;  %2406 = vmatmul.bf16.gmra.mxu2 %v2193_v21  ;;  %v2498_v20 = vperm.slane %v2495_v12, 1 }
 0x672   :  { %v2192_v24 = vpack.c.bf16 %v5506_v23, %v5504_v57  ;;  %v2158_v25 = vmul.f32 %v5506_v23, %v5506_v23 }
 0x674   :  { %2382 = vmatmul.bf16.vlgmr.msrb.gmra.mxu3 %v2192_v24  ;;  %2420 = vmatmul.bf16.vlgmr.msrb.gmra.mxu0 %v2192_v24  ;;  %v2194_v27 = vpack.c.bf16 %v2158_v25, %v2156_v26 }
 0x684   :  { %2387 = vmatmul.bf16.gmra.mxu3 %v2194_v27  ;;  %2425 = vmatmul.bf16.gmra.mxu0 %v2194_v27  ;;  %v2508_v27 = vperm.slane %v2505_v18, 1 }
 0x6dd   :  { %v2364_v29 = vpop.f32.mrf.mxu1 }
 0x6e3   :  { %v2402_v28 = vpop.f32.mrf.mxu2 }
 0x6e5   :  { %v2366_v34 = vpop.f32.mrf.mxu1 }
 0x6eb   :  { %v2404_v31 = vpop.f32.mrf.mxu2 }
 0x6ed   :  { %v2369_v41 = vpop.f32.mrf.mxu1 }
 0x6f1   :  { %v2421_v30 = vpop.f32.mrf.mxu0 }
 0x6f2   :  { %v2422_v36 = vadd.f32 %v2421_v30, %v2402_v28 }
 0x6f3   :  { %v2407_v14 = vpop.f32.mrf.mxu2 }
 0x6f4   :  { %v2432_v38 = vmul.f32 %v2422_v36, %v2422_v36  ;;  %v2444_v3 = vsub.f32 %v5504_v57, %v2422_v36 }
 0x6f5   :  { %v2371_v58 = vpop.f32.mrf.mxu1 }
 0x6f7   :  { %v2383_v10 = vpop.f32.mrf.mxu3 }
 0x6f8   :  { %v5514_v61 = vadd.f32 %v2383_v10, %v2364_v29 }
 0x6f9   :  { %v2423_v32 = vpop.f32.mrf.mxu0 }
 0x6fa   :  { %v5516_v42 = vadd.f32 %v2423_v32, %v2404_v31  ;;  %v2431_v44 = vmul.f32 %v5514_v61, %v5514_v61  ;;  %v2443_v57 = vsub.f32 %v5493_v53, %v5514_v61 }
 0x6fb   :  { %v2409_v47 = vpop.f32.mrf.mxu2 }
 0x6fc   :  { %v2434_v48 = vmul.f32 %v5516_v42, %v5516_v42 }
 0x6ff   :  { %v2385_v37 = vpop.f32.mrf.mxu3 }
 0x700   :  { %v5522_v51 = vadd.f32 %v2385_v37, %v2366_v34 }
 0x701   :  { %v2426_v33 = vpop.f32.mrf.mxu0 }
 0x702   :  { %v2427_v39 = vadd.f32 %v2426_v33, %v2407_v14  ;;  %v2433_v62 = vmul.f32 %v5522_v51, %v5522_v51  ;;  %v2497_v14 = vperm.slane %v2495_v12, 0 }
 0x704   :  { %v2436_v35 = vsub.f32 %v2427_v39, %v2432_v38  ;;  %v2446_v39 = vsub.f32 %v5506_v23, %v5516_v42  ;;  %v2445_v23 = vsub.f32 %v5495_v54, %v5522_v51 }
 0x706   :  { %v2440_v11 = vmax.f32 %v2436_v35, 0.0 }
 0x707   :  { %v2388_v43 = vpop.f32.mrf.mxu3 }
 0x708   :  { %v2448_v45 = vadd.f32 1e-05, %v2440_v11  ;;  %v2389_v46 = vadd.f32 %v2388_v43, %v2369_v41  ;;  %v2507_v41 = vperm.slane %v2505_v18, 0 }
 0x709   :  { %v2428_v40 = vpop.f32.mrf.mxu0 }
 0x70a   :  { %3853 = vrsqrt.f32 %v2448_v45  ;;  %v2435_v49 = vsub.f32 %v2389_v46, %v2431_v44  ;;  %v2429_v50 = vadd.f32 %v2428_v40, %v2409_v47  ;;  %vm2467_vm2 = vweird.f32 %v2448_v45 }
 0x70c   :  { %v2439_v17 = vmax.f32 %v2435_v49, 0.0  ;;  %v2438_v22 = vsub.f32 %v2429_v50, %v2434_v48 }
 0x70e   :  { %v2447_v52 = vadd.f32 1e-05, %v2439_v17  ;;  %v2442_v55 = vmax.f32 %v2438_v22, 0.0 }
 0x70f   :  { %v2390_v59 = vpop.f32.mrf.mxu3 }
 0x710   :  { %v3854_v60 = vpop.eup %3853  ;;  %3855 = vrsqrt.f32 %v2447_v52  ;;  %v2450_v63 = vadd.f32 1e-05, %v2442_v55  ;;  %v2391_v0 = vadd.f32 %v2390_v59, %v2371_v58  ;;  %vm2457_vm5 = vweird.f32 %v2447_v52 }
 0x711   :  { %v2462_v56 = vmul.f32 %v3854_v60, %v2448_v45  ;;  %vm2468_vm1 = vweird.f32 %v3854_v60 }
 0x712   :  { %3857 = vrsqrt.f32 %v2450_v63  ;;  %v2437_v1 = vsub.f32 %v2391_v0, %v2433_v62  ;;  %vm2469_vm3 = vmor %vm2467_vm2, %vm2468_vm1  ;;  %vm2487_vm8 = vweird.f32 %v2450_v63 }
 0x713   :  { %v2463_v2 = vmul.f32 %v3854_v60, %v2462_v56 }
 0x714   :  { %v2441_v4 = vmax.f32 %v2437_v1, 0.0 }
 0x715   :  { %v2464_v5 = vmul.f32 0.5, %v2463_v2 }
 0x716   :  { %v3856_v6 = vpop.eup %3855  ;;  %v2449_v7 = vadd.f32 1e-05, %v2441_v4 }
 0x717   :  { %v2465_v8 = vsub.f32 1.5, %v2464_v5  ;;  %v2452_v13 = vmul.f32 %v3856_v6, %v2447_v52  ;;  %vm2458_vm4 = vweird.f32 %v3856_v6 }
 0x718   :  { %v3858_v15 = vpop.eup %3857  ;;  %3859 = vrsqrt.f32 %v2449_v7  ;;  %vm2459_vm7 = vmor %vm2457_vm5, %vm2458_vm4  ;;  %vm2477_vm11 = vweird.f32 %v2449_v7 }
 0x719   :  { %v2466_v16 = vmul.f32 %v3854_v60, %v2465_v8  ;;  %v2453_v19 = vmul.f32 %v3856_v6, %v2452_v13  ;;  %v2482_v9 = vmul.f32 %v3858_v15, %v2450_v63  ;;  %vm2488_vm6 = vweird.f32 %v3858_v15 }
 0x71a   :  { %vm2489_vm9 = vmor %vm2487_vm8, %vm2488_vm6 }
 0x71b   :  { %v2470_v21 = vsel %vm2469_vm3, %v3854_v60, %v2466_v16  ;;  %v2454_v24 = vmul.f32 0.5, %v2453_v19  ;;  %v2483_v25 = vmul.f32 %v3858_v15, %v2482_v9 }
 0x71c   :  { %v2492_v26 = vmul.f32 %v2470_v21, %v2444_v3 }
 0x71d   :  { %v2455_v28 = vsub.f32 1.5, %v2454_v24  ;;  %v2484_v29 = vmul.f32 0.5, %v2483_v25 }
 0x71e   :  { %v3860_v30 = vpop.eup %3859  ;;  %v2502_v31 = vmul.f32 %v2498_v20, %v2492_v26 }
 0x71f   :  { %v2456_v10 = vmul.f32 %v3856_v6, %v2455_v28  ;;  %v2485_v32 = vsub.f32 1.5, %v2484_v29  ;;  %v2472_v34 = vmul.f32 %v3860_v30, %v2449_v7  ;;  %vm2478_vm10 = vweird.f32 %v3860_v30 }
 0x720   :  { %v2512_v36 = vadd.f32 %v2508_v27, %v2502_v31  ;;  %vm2479_vm12 = vmor %vm2477_vm11, %vm2478_vm10 }
 0x721   :  { %v2460_v37 = vsel %vm2459_vm7, %v3856_v6, %v2456_v10  ;;  %v2486_v33 = vmul.f32 %v3858_v15, %v2485_v32  ;;  %v2473_v38 = vmul.f32 %v3860_v30, %v2472_v34 }
 0x722   :  { %2516 = vst [vmem:[%s5569_s18 + $0x8] sm:$0xff] %v2512_v36  ;;  %v2491_v35 = vmul.f32 %v2460_v37, %v2443_v57 }
 0x723   :  { %v2490_v11 = vsel %vm2489_vm9, %v3858_v15, %v2486_v33  ;;  %v2474_v43 = vmul.f32 0.5, %v2473_v38 }
 0x724   :  { %v2501_v53 = vmul.f32 %v2497_v14, %v2491_v35  ;;  %v2494_v61 = vmul.f32 %v2490_v11, %v2446_v39 }
 0x725   :  { %v2475_v44 = vsub.f32 1.5, %v2474_v43 }
 0x726   :  { %v2511_v45 = vadd.f32 %v2507_v41, %v2501_v53  ;;  %v2504_v46 = vmul.f32 %v2498_v20, %v2494_v61 }
 0x727   :  { %v2476_v47 = vmul.f32 %v3860_v30, %v2475_v44 }
 0x728   :  { %2515 = vst [vmem:[%s5569_s18] sm:$0xff] %v2511_v45  ;;  %v2514_v42 = vadd.f32 %v2508_v27, %v2504_v46 }
 0x729   :  { %v2480_v40 = vsel %vm2479_vm12, %v3860_v30, %v2476_v47 }
 0x72a   :  { %2518 = vst [vmem:[%s5569_s18 + $0x18] sm:$0xff] %v2514_v42  ;;  %v2493_v48 = vmul.f32 %v2480_v40, %v2445_v23 }
 0x72c   :  { %v2503_v49 = vmul.f32 %v2497_v14, %v2493_v48 }
 0x72e   :  { %v2513_v50 = vadd.f32 %v2507_v41, %v2503_v49 }
 0x730   :  { %2517 = vst [vmem:[%s5569_s18 + $0x10] sm:$0xff] %v2513_v50 }

</bundles_post_ra>
